<compile_context>
chip_gen: v7x
topology: tpu7x:2x2x1
jax: 0.10.0
libtpu: 0.0.40
codegen_flags: <defaults>
</compile_context>

<pallas_src>
import functools

import jax
import jax.numpy as jnp
from jax.experimental import pallas as pl
from jax.experimental.pallas import tpu as pltpu

LANES = 128  # padded feature width -> lane-dense loads/stores everywhere


def _gcn_layer_kernel(a_ref, h_ref, w_ref, b_ref, o_ref, acc_ref, *,
                      epilogue, num_classes):
    """One GCN layer: acc += A_tile @ H_tile over k; project + epilogue at k==last."""
    k = pl.program_id(1)

    @pl.when(k == 0)
    def _():
        acc_ref[...] = jnp.zeros_like(acc_ref)

    # Aggregation: (TM, TK) bf16 @ (TK, 128) bf16 -> f32 accumulate (MXU).
    acc_ref[...] += jnp.dot(a_ref[...], h_ref[...],
                            preferred_element_type=jnp.float32)

    @pl.when(k == pl.num_programs(1) - 1)
    def _():
        # Projection + bias + epilogue only once per row tile (finalize branch).
        z = jnp.dot(acc_ref[...], w_ref[...],
                    preferred_element_type=jnp.float32) + b_ref[...]
        if epilogue == "relu":
            o_ref[...] = jnp.maximum(z, 0.0).astype(o_ref.dtype)
        else:  # masked log_softmax over the first `num_classes` (real) columns
            col = jax.lax.broadcasted_iota(jnp.int32, z.shape, 1)
            valid = col < num_classes
            m = jnp.max(jnp.where(valid, z, -jnp.inf), axis=-1, keepdims=True)
            s = z - m
            e = jnp.where(valid, jnp.exp(s), 0.0)
            lse = jnp.log(jnp.sum(e, axis=-1, keepdims=True))
            o_ref[...] = (s - lse).astype(o_ref.dtype)


def _gcn_layer(a, h, w, b, *, tm, tk, epilogue, num_classes, out_dtype):
    n_pad = a.shape[0]
    grid = (n_pad // tm, n_pad // tk)
    kernel = functools.partial(_gcn_layer_kernel, epilogue=epilogue,
                               num_classes=num_classes)
    return pl.pallas_call(
        kernel,
        out_shape=jax.ShapeDtypeStruct((n_pad, LANES), out_dtype),
        grid_spec=pltpu.PrefetchScalarGridSpec(
            num_scalar_prefetch=0,
            grid=grid,
            in_specs=[
                pl.BlockSpec((tm, tk), lambda i, k: (i, k)),         # A tile (bf16)
                pl.BlockSpec((tk, LANES), lambda i, k: (k, 0)),      # H row block (bf16)
                pl.BlockSpec((LANES, LANES), lambda i, k: (0, 0)),   # W (resident)
                pl.BlockSpec((1, LANES), lambda i, k: (0, 0)),       # b (resident)
            ],
            out_specs=pl.BlockSpec((tm, LANES), lambda i, k: (i, 0)),
            scratch_shapes=[pltpu.VMEM((tm, LANES), jnp.float32)],   # f32 accumulator
        ),
        compiler_params=pltpu.CompilerParams(
            dimension_semantics=("parallel", "arbitrary"),
            vmem_limit_bytes=32 * 1024 * 1024,
        ),
    )(a, h, w, b)


def _round_up(x, m):
    return (x + m - 1) // m * m


def _pad2(x, rows, cols, dtype):
    out = jnp.zeros((rows, cols), dtype)
    return out.at[: x.shape[0], : x.shape[1]].set(x.astype(dtype))


def citation_full_gcn(a_norm, x, w1, b1, w2, b2, w3, b3, *, tm=256, tk=512):
    """Eval-mode forward pass. a_norm is the dense normalized adjacency [N, N]."""
    n, _ = x.shape
    out_features = w3.shape[1]

    # Tile sizes: tk is a power of two in [128, 512]; tm <= tk so tm | n_pad.
    tk = min(tk, pl.next_power_of_2(max(n, LANES)))
    tm = min(tm, tk)
    n_pad = _round_up(n, tk)

    # bf16 streaming operands (aggregation is HBM-bandwidth bound), f32 params.
    a_bf16 = _pad2(a_norm, n_pad, n_pad, jnp.bfloat16)
    h0 = _pad2(x, n_pad, LANES, jnp.bfloat16)
    w1p = _pad2(w1, LANES, LANES, jnp.float32)
    w2p = _pad2(w2, LANES, LANES, jnp.float32)
    w3p = _pad2(w3, LANES, LANES, jnp.float32)
    b1p = _pad2(b1.reshape(1, -1), 1, LANES, jnp.float32)
    b2p = _pad2(b2.reshape(1, -1), 1, LANES, jnp.float32)
    b3p = _pad2(b3.reshape(1, -1), 1, LANES, jnp.float32)

    # conv1 + ReLU (+ dropout == identity in eval mode)
    h1 = _gcn_layer(a_bf16, h0, w1p, b1p, tm=tm, tk=tk,
                    epilogue="relu", num_classes=0, out_dtype=jnp.bfloat16)
    # conv2 + ReLU (+ dropout == identity in eval mode)
    h2 = _gcn_layer(a_bf16, h1, w2p, b2p, tm=tm, tk=tk,
                    epilogue="relu", num_classes=0, out_dtype=jnp.bfloat16)
    # conv3 + log_softmax over the real classes only
    out = _gcn_layer(a_bf16, h2, w3p, b3p, tm=tm, tk=tk,
                     epilogue="log_softmax", num_classes=out_features,
                     out_dtype=jnp.float32)
    return out[:n, :out_features]


def normalized_adjacency(edge_index, num_nodes):
    """Dense D^{-1/2} (A + I) D^{-1/2} matching PyG gcn_norm:
    duplicate edges sum; every node gets exactly one weight-1 self-loop."""
    src, dst = edge_index[0], edge_index[1]
    w = (src != dst).astype(jnp.float32)  # drop pre-existing self-loops
    a = jnp.zeros((num_nodes, num_nodes), jnp.float32).at[dst, src].add(w)
    a = a + jnp.eye(num_nodes, dtype=jnp.float32)  # add_remaining_self_loops
    deg = jnp.sum(a, axis=1)
    dinv = jnp.where(deg > 0, jax.lax.rsqrt(deg), 0.0)
    return dinv[:, None] * a * dinv[None, :]


def _reference(a_norm, x, w1, b1, w2, b2, w3, b3):
    h = jnp.maximum(a_norm @ (x @ w1) + b1, 0.0)
    h = jnp.maximum(a_norm @ (h @ w2) + b2, 0.0)
    z = a_norm @ (h @ w3) + b3
    return jax.nn.log_softmax(z, axis=1)


def _glorot(key, fan_in, fan_out):
    lim = jnp.sqrt(6.0 / (fan_in + fan_out))
    return jax.random.uniform(key, (fan_in, fan_out), jnp.float32, -lim, lim)


if __name__ == "__main__":
    N = 1000           # number of nodes (exercises padding to 1024 and a 4x2 grid)
    E = 5000           # number of edges
    IN_FEATURES = 16
    OUT_FEATURES = 8   # number of classes

    key = jax.random.PRNGKey(0)
    kx, ke, k1, k2, k3 = jax.random.split(key, 5)

    x = jax.random.normal(kx, (N, IN_FEATURES), dtype=jnp.float32)
    edge_index = jax.random.randint(ke, (2, E), 0, N, dtype=jnp.int32)

    w1 = _glorot(k1, IN_FEATURES, 64)
    b1 = jnp.zeros((64,), jnp.float32)
    w2 = _glorot(k2, 64, 32)
    b2 = jnp.zeros((32,), jnp.float32)
    w3 = _glorot(k3, 32, OUT_FEATURES)
    b3 = jnp.zeros((OUT_FEATURES,), jnp.float32)

    a_norm = normalized_adjacency(edge_index, N)

    out = citation_full_gcn(a_norm, x, w1, b1, w2, b2, w3, b3)
    out = jax.block_until_ready(out)

    assert out.shape == (N, OUT_FEATURES)
    # rows of log_softmax must sum (in prob space) to 1
    assert jnp.allclose(jnp.sum(jnp.exp(out), axis=1), 1.0, atol=1e-3)
    # compare against the pure-JAX f32 reference (bf16 aggregation -> loose tol)
    ref = _reference(a_norm, x, w1, b1, w2, b2, w3, b3)
    max_err = float(jnp.max(jnp.abs(out - ref)))
    assert max_err < 0.1, max_err
    print("KERNEL_OK")
</pallas_src>

<mosaic_0001>
module attributes {stable_mosaic.version = 11 : i64} {
  func.func @_gcn_layer_kernel(%arg0: i32, %arg1: i32, %arg2: memref<256x512xbf16, #tpu.memory_space<vmem>>, %arg3: memref<512x128xbf16, #tpu.memory_space<vmem>>, %arg4: memref<128x128xf32, #tpu.memory_space<vmem>>, %arg5: memref<1x128xf32, #tpu.memory_space<vmem>>, %arg6: memref<256x128xbf16, #tpu.memory_space<vmem>>, %arg7: memref<256x128xf32, #tpu.memory_space<vmem>>) attributes {dimension_semantics = [#tpu.dimension_semantics<parallel>, #tpu.dimension_semantics<arbitrary>], iteration_bounds = array<i64: 4, 2>, scalar_prefetch = 0 : i64, scratch_operands = 1 : i64, tpu.core_type = #tpu.core_type<tc>, window_params = [{transform_indices = @transform_0, window_bounds = array<i64: 256, 512>}, {transform_indices = @transform_1, window_bounds = array<i64: 512, 128>}, {pipeline_mode = #tpu.pipeline_mode<synchronous>, transform_indices = @transform_2, window_bounds = array<i64: 128, 128>}, {pipeline_mode = #tpu.pipeline_mode<synchronous>, transform_indices = @transform_3, window_bounds = array<i64: 1, 128>}, {transform_indices = @transform_4, window_bounds = array<i64: 256, 128>}]} {
    %c0_i32 = arith.constant 0 : i32
    %0 = arith.cmpi eq, %arg1, %c0_i32 : i32
    %1 = arith.extui %0 : i1 to i32
    %c0_i32_0 = arith.constant 0 : i32
    %2 = arith.cmpi ne, %1, %c0_i32_0 : i32
    scf.if %2 {
      %cst_9 = arith.constant 0.000000e+00 : f32
      %12 = vector.broadcast %cst_9 : f32 to vector<256x128xf32>
      %c0_10 = arith.constant 0 : index
      %c0_11 = arith.constant 0 : index
      %13 = vector.load %arg7[%c0_10, %c0_11] : memref<256x128xf32, #tpu.memory_space<vmem>>, vector<256x128xf32>
      tpu.vector_store %arg7[%c0_10, %c0_11], %12 {strides = array<i32>} : memref<256x128xf32, #tpu.memory_space<vmem>>, vector<256x128xf32>,
    } else {
    }
    %c0 = arith.constant 0 : index
    %c0_1 = arith.constant 0 : index
    %3 = vector.load %arg7[%c0, %c0_1] : memref<256x128xf32, #tpu.memory_space<vmem>>, vector<256x128xf32>
    %c0_2 = arith.constant 0 : index
    %c0_3 = arith.constant 0 : index
    %4 = vector.load %arg2[%c0_2, %c0_3] : memref<256x512xbf16, #tpu.memory_space<vmem>>, vector<256x512xbf16>
    %c0_4 = arith.constant 0 : index
    %c0_5 = arith.constant 0 : index
    %5 = vector.load %arg3[%c0_4, %c0_5] : memref<512x128xbf16, #tpu.memory_space<vmem>>, vector<512x128xbf16>
    %cst = arith.constant dense<0.000000e+00> : vector<256x128xf32>
    %6 = tpu.matmul %4, %5, %cst {dimension_numbers = #tpu.dot_dimension_numbers<[1], [0], [0], [1], [0, 0, 1, 1], [], []>} : vector<256x512xbf16>, vector<512x128xbf16>, vector<256x128xf32> -> vector<256x128xf32>
    %7 = arith.addf %3, %6 : vector<256x128xf32>
    %c0_6 = arith.constant 0 : index
    %c0_7 = arith.constant 0 : index
    %8 = vector.load %arg7[%c0_6, %c0_7] : memref<256x128xf32, #tpu.memory_space<vmem>>, vector<256x128xf32>
    tpu.vector_store %arg7[%c0_6, %c0_7], %7 {strides = array<i32>} : memref<256x128xf32, #tpu.memory_space<vmem>>, vector<256x128xf32>,
    %c1_i32 = arith.constant 1 : i32
    %9 = arith.cmpi eq, %arg1, %c1_i32 : i32
    %10 = arith.extui %9 : i1 to i32
    %c0_i32_8 = arith.constant 0 : i32
    %11 = arith.cmpi ne, %10, %c0_i32_8 : i32
    scf.if %11 {
      %c0_9 = arith.constant 0 : index
      %c0_10 = arith.constant 0 : index
      %12 = vector.load %arg7[%c0_9, %c0_10] : memref<256x128xf32, #tpu.memory_space<vmem>>, vector<256x128xf32>
      %c0_11 = arith.constant 0 : index
      %c0_12 = arith.constant 0 : index
      %13 = vector.load %arg4[%c0_11, %c0_12] : memref<128x128xf32, #tpu.memory_space<vmem>>, vector<128x128xf32>
      %cst_13 = arith.constant dense<0.000000e+00> : vector<256x128xf32>
      %14 = tpu.matmul %12, %13, %cst_13 {dimension_numbers = #tpu.dot_dimension_numbers<[1], [0], [0], [1], [0, 0, 1, 1], [], []>} : vector<256x128xf32>, vector<128x128xf32>, vector<256x128xf32> -> vector<256x128xf32>
      %c0_14 = arith.constant 0 : index
      %c0_15 = arith.constant 0 : index
      %15 = vector.load %arg5[%c0_14, %c0_15] : memref<1x128xf32, #tpu.memory_space<vmem>>, vector<1x128xf32>
      %16 = vector.broadcast %15 : vector<1x128xf32> to vector<256x128xf32>
      %17 = arith.addf %14, %16 : vector<256x128xf32>
      %cst_16 = arith.constant 0.000000e+00 : f32
      %18 = vector.broadcast %cst_16 : f32 to vector<256x128xf32>
      %19 = arith.maximumf %17, %18 : vector<256x128xf32>
      %20 = arith.truncf %19 : vector<256x128xf32> to vector<256x128xbf16>
      %c0_17 = arith.constant 0 : index
      %c0_18 = arith.constant 0 : index
      %21 = vector.load %arg6[%c0_17, %c0_18] : memref<256x128xbf16, #tpu.memory_space<vmem>>, vector<256x128xbf16>
      tpu.vector_store %arg6[%c0_17, %c0_18], %20 {strides = array<i32>} : memref<256x128xbf16, #tpu.memory_space<vmem>>, vector<256x128xbf16>,
    } else {
    }
    return
  }
  func.func @transform_0(%arg0: i32, %arg1: i32) -> (i32, i32) {
    %c0_i32 = arith.constant 0 : i32
    return %arg0, %arg1 : i32, i32
  }
  func.func @transform_1(%arg0: i32, %arg1: i32) -> (i32, i32) {
    %c0_i32 = arith.constant 0 : i32
    %c0_i32_0 = arith.constant 0 : i32
    return %arg1, %c0_i32 : i32, i32
  }
  func.func @transform_2(%arg0: i32, %arg1: i32) -> (i32, i32) {
    %c0_i32 = arith.constant 0 : i32
    %c0_i32_0 = arith.constant 0 : i32
    %c0_i32_1 = arith.constant 0 : i32
    return %c0_i32, %c0_i32_0 : i32, i32
  }
  func.func @transform_3(%arg0: i32, %arg1: i32) -> (i32, i32) {
    %c0_i32 = arith.constant 0 : i32
    %c0_i32_0 = arith.constant 0 : i32
    %c0_i32_1 = arith.constant 0 : i32
    return %c0_i32, %c0_i32_0 : i32, i32
  }
  func.func @transform_4(%arg0: i32, %arg1: i32) -> (i32, i32) {
    %c0_i32 = arith.constant 0 : i32
    %c0_i32_0 = arith.constant 0 : i32
    return %arg0, %c0_i32 : i32, i32
  }
}

</mosaic_0001>

<bundles_post_ra>
// kernel: tpu_custom_call.1
= control target key start
LH: loop header
LB: loop body
LE: loop exit
PB: predicated region body
PF: predicated region fallthrough
CT: control target
= control target key end

     0   :  { %s3872_s0 = inlined_call_operand.hbm [shape: bf16[1024,1024], index: 0, kind: input, shape index: {}]   ;;  %s3873_s1 = inlined_call_operand.hbm [shape: bf16[1024,128], index: 1, kind: input, shape index: {}]   ;;  %s3874_s2 = inlined_call_operand.hbm [shape: f32[128,128], index: 2, kind: input, shape index: {}]   ;;  %s3875_s3 = inlined_call_operand.hbm [shape: f32[1,128], index: 3, kind: input, shape index: {}]   ;;  %s3876_s4 = inlined_call_operand.hbm [shape: bf16[1024,128], index: 4, kind: output, shape index: {}]  }
   0x1   :  { %3894 = sst [smem:[#allocation26_spill]] %s3872_s0 }
   0x2   :  { %3895 = sst [smem:[#allocation27_spill]] %s3874_s2 }
   0x3   :  { %3896 = sst [smem:[#allocation28_spill]] %s3875_s3 }
   0x4   :  { %3897 = sst [smem:[#allocation29_spill]] %s3876_s4 }
   0x5   :  { %9 = vsyncpa [#allocation4], 0 }
   0x6   :  { %11 = vsyncpa [#allocation4 + $0x1], 0 }
   0x7   :  { %12 = vsyncpa [#allocation7], 0 }
   0x8   :  { %14 = vsyncpa [#allocation7 + $0x1], 0 }
   0x9   :  { %15 = vsyncpa [#allocation10], 0 }
   0xa   :  { %16 = vsyncpa [#allocation5], 0 }
   0xb   :  { %18 = vsyncpa [#allocation5 + $0x1], 0  ;;  %s3310_s15 = smov 0   ;;  %s3312_s16 = smov 0  }
   0xc   :  { %s3314_s17 = smov 0   ;;  %s3316_s18 = smov 0  }
   0xd   :  { %s3318_s19 = smov 0   ;;  %s3320_s20 = smov 0  }
   0xe   :  { %s3322_s21 = smov 0   ;;  %s3324_s22 = smov 0  }
   0xf   :  { %s3326_s23 = smov 0   ;;  %s3328_s24 = smov 0  }
  0x10   :  { %s3330_s25 = smov 0   ;;  %s3332_s26 = smov 0  }
  0x11   :  { %s3334_s27 = smov 0   ;;  %s3336_s28 = smov 0  }
  0x12 LB: > { %3898 = sst [smem:[#allocation17_spill]] %s3216_s15  ;;  %s3377_s29 = sadd.s32 4294967295, %s3268_s28   ;;  %s3268_s28 = sphi %s3336_s28, %s24_s28   ;;  %s3264_s27 = sphi %s3334_s27, %s3944_s27   ;;  %s3260_s26 = sphi %s3332_s26, %s3955_s26   ;;  %s3256_s25 = sphi %s3330_s25, %s3954_s25   ;;  %s3252_s24 = sphi %s3328_s24, %s3953_s24   ;;  %s3248_s23 = sphi %s3326_s23, %s3952_s23   ;;  %s3244_s22 = sphi %s3324_s22, %s3951_s22   ;;  %s3240_s21 = sphi %s3322_s21, %s3950_s21   ;;  %s3236_s20 = sphi %s3320_s20, %s3949_s20   ;;  %s3232_s19 = sphi %s3318_s19, %s3948_s19   ;;  %s3228_s18 = sphi %s3316_s18, %s3947_s18   ;;  %s3224_s17 = sphi %s3314_s17, %s3946_s17   ;;  %s3220_s16 = sphi %s3312_s16, %s3945_s16   ;;  %s3216_s15 = sphi %s3310_s15, %s3941_s15  }
  0x13   : > { %3899 = sst [smem:[#allocation18_spill]] %s3220_s16  ;;  %s2019_s30 = sadd.s32 4294967294, %s3268_s28  }
  0x14   : > { %3900 = sst [smem:[#allocation19_spill]] %s3252_s24  ;;  %p58_p0 = scmp.ne.s32.totalorder %s3244_s22, %s3240_s21 }
  0x15   : > { %3901 = sst [smem:[#allocation20_spill]] %s3256_s25  ;;  %p3880_p1 = scmp.eq.s32.totalorder %s3377_s29, 0 }
  0x16   : > { %3902 = sst [smem:[#allocation21_spill]] %s3264_s27  ;;  %p84_p2 = scmp.ne.s32.totalorder %s3232_s19, %s3228_s18 }
  0x17   : > { %p3386_p3 = por %p3880_p1, %p58_p0  ;;  %p149_p4 = scmp.ne.s32.totalorder %s3224_s17, %s3220_s16 }
  0x18   : > { %p3394_p5 = por %p84_p2, %p3880_p1  ;;  %p150_p6 = scmp.eq.s32.totalorder %s3377_s29, 7 }
  0x19   : > { %s3903_s6 = scalar_select %p3386_p3, 1, 0 }
  0x1a   : > { %s3904_s7 = scalar_select %p3394_p5, 1, 0 }
  0x1b   : > { %p155_p7 = scmp.ne.s32.totalorder %s3220_s16, %s3216_s15  ;;  %p156_p8 = scmp.eq.s32.totalorder %s2019_s30, 7 }
  0x1c   : > { %p3401_p9 = por %p150_p6, %p149_p4  ;;  %p2020_p10 = scmp.ge.s32.totalorder %s3268_s28, 1 }
  0x1d   : > { %p3406_p11 = por %p156_p8, %p155_p7  ;;  %p163_p12 = scmp.lt.s32.totalorder %s3268_s28, 9 }
  0x1e   : > { %s3905_s8 = scalar_select %p3401_p9, 1, 0 }
  0x1f   : > { %s3907_s9 = scalar_select %p3406_p11, 1, 0 }
  0x20   : > { %3906 = sst [smem:[#allocation22_spill]] %s3905_s8  ;;  %p3411_p13 = pnand %p2020_p10, %p163_p12 }
  0x21   : > { %3908 = sst [smem:[#allocation23_spill]] %s3907_s9  ;;  %s3270_s11 = smov [#allocation8]  }
  0x22   : > { %s3909_s10 = scalar_select %p3411_p13, 1, 0 }
  0x23   : > { %s175_s12 = sshll.u32 %s3270_s11, 4  ;;  %p2718_p0 = pneg %p3411_p13  ;;  %s176_s12 = int_to_ptr.vmem [resolvable:$true] %s175_s12 }
  0x24   : > { %s3271_s14 = smov [#allocation9]   ;;  %s3911_s2 = sld [smem:[#allocation27_spill]] }
  0x25   : > { %p3419_p2 = pnand %p2718_p0, %p3880_p1  ;;  %s189_s18 = sshll.u32 %s3271_s14, 4  ;;  %s3423_s18 = int_to_ptr.vmem [resolvable:$true] %s189_s18 }
  0x27   : > { %p2996_p6 = pneg %p3419_p2 }
  0x2a   : > { %s2994_s5 = scalar_lea.hbm %s3911_s2, 2048 }
  0x2b   : > { %p2995_p4 = scmp.ne.s32.totalorder %s3911_s2, %s2994_s5  ;;  %p3001_p10 = scmp.lt.u32.totalorder %s2994_s5, %s3911_s2 }
  0x2d   : > { %p2997_p7 = pnand %p2996_p6, %p2995_p4 }
  0x2f   : > { %p2998_p8 = pneg %p2997_p7 }
  0x31   : > { %p3003_p12 = pnand %p3001_p10, %p2998_p8 }
  0x33   : > { %3006 = shalt.err (!%p3003_p12)
}
  0x34   : > { %s3007_s14 = scalar_lea.vmem %s176_s12, 2048  ;;  %p3015_p9 = scmp.lt.s32.totalorder %s176_s12, %s176_s12 }
  0x35   : > { %p3008_p0 = scmp.ne.s32.totalorder %s176_s12, %s3007_s14  ;;  %p3016_p5 = scmp.lt.s32.totalorder %s3007_s14, %s3007_s14 }
  0x37   : > { %p3010_p1 = pnand %p3008_p0, %p2996_p6  ;;  %p3017_p3 = por %p3016_p5, %p3015_p9 }
  0x39   : > { %p3011_p11 = pneg %p3010_p1 }
  0x3b   : > { %p3018_p13 = pnand %p3017_p3, %p3011_p11 }
  0x3d   : > { %3021 = shalt.err (!%p3018_p13)
}
  0x3e   : > { %s3272_s9 = smov 128   ;;  %s3273_s21 = smov 8  }
  0x3f   : > { %2721 = dma.hbm_to_vmem [thread:$0]  (!%p3419_p2), %s3911_s2, 2048, %s176_s12, [#allocation7], %s3272_s9, %s3272_s9, %s3273_s21  }
  0x40   : > { %s3912_s3 = sld [smem:[#allocation28_spill]] }
  0x46   : > { %s3022_s11 = scalar_lea.hbm %s3912_s3, 16 }
  0x47   : > { %p3023_p1 = scmp.ne.s32.totalorder %s3912_s3, %s3022_s11  ;;  %p3029_p9 = scmp.lt.u32.totalorder %s3022_s11, %s3912_s3 }
  0x49   : > { %p3025_p3 = pnand %p3023_p1, %p2996_p6 }
  0x4b   : > { %p3026_p5 = pneg %p3025_p3 }
  0x4d   : > { %p3031_p11 = pnand %p3029_p9, %p3026_p5 }
  0x4f   : > { %3034 = shalt.err (!%p3031_p11)
}
  0x50   : > { %s3035_s12 = scalar_lea.vmem %s3423_s18, 16  ;;  %s3042_s25 = scalar_lea.vmem %s3423_s18, 32 }
  0x51   : > { %p3036_p13 = scmp.ne.s32.totalorder %s3423_s18, %s3035_s12  ;;  %p3043_p8 = scmp.lt.s32.totalorder %s3423_s18, %s3423_s18 }
  0x52   : > { %p3044_p10 = scmp.lt.s32.totalorder %s3042_s25, %s3035_s12 }
  0x53   : > { %p3038_p4 = pnand %p3036_p13, %p2996_p6 }
  0x54   : > { %p3045_p12 = por %p3044_p10, %p3043_p8 }
  0x55   : > { %p3039_p7 = pneg %p3038_p4 }
  0x57   : > { %p3046_p0 = pnand %p3045_p12, %p3039_p7 }
  0x59   : > { %3049 = shalt.err (!%p3046_p0)
}
  0x5a   : > { %2724 = dma.hbm_to_vmem [thread:$0]  (!%p3419_p2), %s3912_s3, 16, %s3423_s18, [#allocation10]  }
  0x5b   : > { %s33_s9 = sadd.s32 1, %s3260_s26  ;;  %s36_s21 = sadd.s32 1, %s3264_s27 }
  0x5c   : > { %p34_p6 = scmp.ge.s32.totalorder %s33_s9, 2  ;;  %s45_s13 = sadd.s32 1, %s3248_s23 }
  0x5d   : > { %p52_p1 = scmp.ne.s32.totalorder %s3248_s23, %s3244_s22  ;;  %p3892_p3 = scmp.eq.s32.totalorder %s3268_s28, 0 }
  0x5e   : > { %s3957_s9 = smov (%p34_p6, %s33_s9), 0  ;;  %s3959_s21 = smov (!%p34_p6, %s36_s21), %s3264_s27 }
  0x5f   : > { %3913 = sst [smem:[#allocation24_spill]] %s3957_s9  ;;  %s3484_s4 = ssub.s32 %s3260_s26, %s3957_s9 }
  0x60   : > { %p3488_p2 = por %p3892_p3, %p52_p1  ;;  %p38_p5 = scmp.ge.s32.totalorder %s3959_s21, 4 }
  0x61   : > { %p69_p9 = scmp.eq.s32.totalorder %s3484_s4, 0  ;;  %p3891_p11 = scmp.lt.s32.totalorder %s3268_s28, 8 }
  0x62   : > { %s200_s15 = sand.u32 1, %s3248_s23   ;;  %s3961_s21 = smov (%p38_p5, %s3959_s21), 0 }
  0x63   : > { %3915 = sst [smem:[#allocation25_spill]] %s3961_s21  ;;  %s2024_s5 = sshll.u32 %s200_s15, 9 }
  0x64   : > { %s40_s30 = ssub.s32 %s3264_s27, %s3961_s21  ;;  %s2026_s14 = sshll.u32 %s3260_s26, 2 }
  0x65   : > { %s42_s11 = sor.u32 %s3484_s4, %s40_s30  ;;  %p137_p13 = scmp.eq.s32.totalorder %s40_s30, 0 }
  0x66   : > { %p43_p4 = scmp.eq.s32.totalorder %s42_s11, 0  ;;  %s3916_s12 = sadd.s32 1, %s3224_s17 }
  0x67   : > { %s3504_s25 = scalar_select %p137_p13, %s3224_s17, %s3916_s12  }
  0x68   : > { %s3507_s24 = scalar_select %p43_p4, %s3248_s23, %s45_s13  }
  0x69   : > { %s2174_s8 = sshll.u32 %s3264_s27, 8  ;;  %s204_s2 = scalar_lea.vmem [#allocation3], %s2024_s5 }
  0x6a   : > { %s214_s3 = sshll.u32 %s204_s2, 4  ;;  %s211_s9 = sadd.s32 %s2174_s8, %s2026_s14  ;;  %s3510_s3 = int_to_ptr.vmem [resolvable:$true] %s214_s3 }
  0x6b   : > { %s2028_s16 = sshll.u32 %s211_s9, 6  ;;  %p3516_p7 = pnand %p3891_p11, %p3488_p2 }
  0x6c   : > { %s3918_s0 = sld [smem:[#allocation26_spill]]  ;;  %s3525_s2 = scalar_lea.sflag [#allocation4], %s200_s15 }
  0x6d   : > { %p3052_p10 = pneg %p3516_p7 }
  0x72   : > { %s3523_s13 = scalar_lea.hbm %s3918_s0, %s2028_s16  ;;  %s3055_s14 = scalar_lea.hbm %s3918_s0, 65536 }
  0x73   : > { %s3050_s9 = scalar_lea.hbm %s3523_s13, 8192  ;;  %p3056_p6 = scmp.lt.u32.totalorder %s3523_s13, %s3918_s0 }
  0x74   : > { %p3051_p8 = scmp.ne.s32.totalorder %s3523_s13, %s3050_s9  ;;  %p3057_p1 = scmp.lt.u32.totalorder %s3055_s14, %s3050_s9 }
  0x75   : > { %p3059_p5 = scmp.lt.u32.totalorder %s3050_s9, %s3523_s13 }
  0x76   : > { %p3053_p12 = pnand %p3052_p10, %p3051_p8  ;;  %p3058_p2 = por %p3057_p1, %p3056_p6 }
  0x78   : > { %p3054_p0 = pneg %p3053_p12  ;;  %p3060_p13 = por %p3059_p5, %p3058_p2 }
  0x7a   : > { %p3061_p4 = pnand %p3060_p13, %p3054_p0 }
  0x7c   : > { %3064 = shalt.err (!%p3061_p4)
}
  0x7d   : > { %s3065_s15 = scalar_lea.vmem %s3510_s3, 8192  ;;  %s3274_s8 = smov [#allocation3]  }
  0x7e   : > { %p3066_p8 = scmp.ne.s32.totalorder %s3510_s3, %s3065_s15  ;;  %s3070_s30 = sshll.u32 %s3274_s8, 4  ;;  %s3071_s30 = int_to_ptr.vmem [resolvable:$false] %s3070_s30 }
  0x7f   : > { %s3072_s11 = scalar_lea.vmem %s3071_s30, 16384  ;;  %p3073_p3 = scmp.lt.s32.totalorder %s3510_s3, %s3071_s30 }
  0x80   : > { %p3068_p12 = pnand %p3066_p8, %p3052_p10  ;;  %p3074_p6 = scmp.lt.s32.totalorder %s3072_s11, %s3065_s15 }
  0x82   : > { %p3069_p11 = pneg %p3068_p12  ;;  %p3075_p1 = por %p3074_p6, %p3073_p3 }
  0x84   : > { %p3076_p2 = pnand %p3075_p1, %p3069_p11 }
  0x86   : > { %3079 = shalt.err (!%p3076_p2)
}
  0x87   : > { %s3275_s9 = smov 512   ;;  %s3276_s18 = smov 256  }
  0x88   : > { %s3277_s5 = smov 16   ;;  %s224_s14 = sand.u32 1, %s3268_s28  }
  0x89   : > { %2728 = dma.hbm_to_vmem [thread:$0]  (!%p3516_p7), %s3523_s13, 8192, %s3510_s3, %s3525_s2, %s3275_s9, %s3276_s18, %s3277_s5  }
  0x8a   : > { %s71_s16 = sadd.s32 1, %s3236_s20  ;;  %p78_p3 = scmp.ne.s32.totalorder %s3236_s20, %s3232_s19 }
  0x8b   : > { %s3560_s12 = scalar_select %p69_p9, %s3236_s20, %s71_s16  }
  0x8c   : > { %p3919_p11 = scmp.eq.s32.totalorder %s3268_s28, 0  ;;  %s226_s15 = sand.u32 1, %s3236_s20  }
  0x8d   : > { %s2175_s8 = sshll.u32 %s3260_s26, 12  ;;  %s2029_s30 = sshll.u32 %s226_s15, 8 }
  0x8e   : > { %p80_p10 = por %p78_p3, %p3919_p11  ;;  %s3569_s27 = scalar_lea.hbm %s3873_s1, %s2175_s8 }
  0x8f   : > { %p3920_p0 = scmp.lt.s32.totalorder %s3268_s28, 8  ;;  %s228_s21 = scalar_lea.vmem [#allocation6], %s2029_s30 }
  0x90   : > { %s235_s4 = sshll.u32 %s228_s21, 4  ;;  %s3579_s13 = scalar_lea.sflag [#allocation7], %s224_s14  ;;  %s3577_s4 = int_to_ptr.vmem [resolvable:$true] %s235_s4 }
  0x91   : > { %p3573_p7 = pnand %p3920_p0, %p80_p10  ;;  %s3080_s0 = scalar_lea.hbm %s3569_s27, 4096 }
  0x92   : > { %p3081_p9 = scmp.ne.s32.totalorder %s3569_s27, %s3080_s0  ;;  %s3085_s18 = scalar_lea.hbm %s3873_s1, 8192 }
  0x93   : > { %p3082_p5 = pneg %p3573_p7  ;;  %p3086_p8 = scmp.lt.u32.totalorder %s3569_s27, %s3873_s1 }
  0x94   : > { %p3087_p12 = scmp.lt.u32.totalorder %s3085_s18, %s3080_s0  ;;  %p3089_p1 = scmp.lt.u32.totalorder %s3080_s0, %s3569_s27 }
  0x95   : > { %p3083_p13 = pnand %p3082_p5, %p3081_p9 }
  0x96   : > { %p3088_p6 = por %p3087_p12, %p3086_p8 }
  0x97   : > { %p3084_p4 = pneg %p3083_p13 }
  0x98   : > { %p3090_p2 = por %p3089_p1, %p3088_p6 }
  0x9a   : > { %p3091_p3 = pnand %p3090_p2, %p3084_p4 }
  0x9c   : > { %3094 = shalt.err (!%p3091_p3)
}
  0x9d   : > { %s3095_s14 = scalar_lea.vmem %s3577_s4, 4096  ;;  %s3278_s15 = smov [#allocation6]  }
  0x9e   : > { %p3096_p11 = scmp.ne.s32.totalorder %s3577_s4, %s3095_s14  ;;  %s3100_s8 = sshll.u32 %s3278_s15, 4  ;;  %s3101_s8 = int_to_ptr.vmem [resolvable:$false] %s3100_s8 }
  0x9f   : > { %s3102_s30 = scalar_lea.vmem %s3101_s8, 8192  ;;  %p3103_p9 = scmp.lt.s32.totalorder %s3577_s4, %s3101_s8 }
  0xa0   : > { %p3098_p10 = pnand %p3096_p11, %p3082_p5  ;;  %p3104_p13 = scmp.lt.s32.totalorder %s3102_s30, %s3095_s14 }
  0xa2   : > { %p3099_p0 = pneg %p3098_p10  ;;  %p3105_p8 = por %p3104_p13, %p3103_p9 }
  0xa4   : > { %p3106_p12 = pnand %p3105_p8, %p3099_p0 }
  0xa6   : > { %3109 = shalt.err (!%p3106_p12)
}
  0xa7   : > { %s3279_s11 = smov 64   ;;  %s3280_s21 = smov 4  }
  0xa8   : > { %2731 = dma.hbm_to_vmem [thread:$0]  (!%p3573_p7), %s3569_s27, 4096, %s3577_s4, %s3579_s13, %s3279_s11, %s3279_s11, %s3280_s21  }
  0xa9   : > { %p3922_p5 = scmp.ne.s32.totalorder %s3909_s10, 0 }
  0xaa   : > { %s249_s0 = sand.u32 (!%p3922_p5), 1, %s3244_s22   ;;  %p3923_p4 = scmp.ne.s32.totalorder (!%p3922_p5), %s3903_s6, 0 }
  0xab   : > { %247 = sbr.rel (%p3922_p5) target bundleno = 874 (0x36a), region = 36  ;;  %s2033_s2 = sshll.u32 (!%p3922_p5), %s249_s0, 9 }
  0xac   : > { %s250_s9 = scalar_lea.sflag (!%p3922_p5), [#allocation4], %s249_s0  ;;  %s3610_s18 = scalar_lea.vmem (!%p3922_p5), [#allocation3], %s2033_s2 }
  0xb2   : > { %3195 = dma.done.wait (%p3923_p4), %s250_s9, 8192  }
  0xb3   : > { %3197 = vsyncadd (%p3923_p4), %s250_s9, 4294959104  ;;  %s258_s3 = sand.u32 1, %s3377_s29   ;;  %s260_s27 = sand.u32 1, %s3232_s19  }
  0xb4   : > { %s2034_s4 = sshll.u32 %s260_s27, 8  ;;  %s259_s10 = scalar_lea.sflag [#allocation7], %s258_s3 }
  0xb5   : > { %s3618_s13 = scalar_lea.vmem [#allocation6], %s2034_s4  ;;  %p3924_p7 = scmp.ne.s32.totalorder %s3904_s7, 0 }
  0xb7   : > { %3199 = dma.done.wait (%p3924_p7), %s259_s10, 4096  }
  0xb8   : > { %3201 = vsyncadd (%p3924_p7), %s259_s10, 4294963200  ;;  %p3925_p6 = scmp.eq.s32.totalorder %s3377_s29, 0 }
  0xba   : > { %3203 = dma.done.wait (%p3925_p6), [#allocation7], 2048   ;;  %p3926_p1 = pmov %p3925_p6 }
  0xbc   : > { %3205 = vsyncadd (%p3926_p1), [#allocation7], 4294965248  ;;  %p3927_p2 = pmov %p3926_p1 }
  0xbd   : > { %p3928_p3 = pmov %p3926_p1 }
  0xbe   : > { %3207 = dma.done.wait (%p3927_p2), [#allocation10], 16  }
  0xbf   : > { %3209 = vsyncadd (%p3928_p3), [#allocation10], 4294967280  ;;  %s3929_s6 = sld [smem:[#allocation18_spill]]  ;;  %s3930_s7 = sld [smem:[#allocation19_spill]] }
  0xc5   : > { %s297_s5 = sand.u32 1, %s3929_s6   ;;  %p2038_p11 = scmp.ne.s32.totalorder %s3930_s7, 0 }
  0xc6   : > { %s2037_s16 = sshll.u32 %s297_s5, 7  ;;  %v3281_v0 = vmov (!%p2038_p11), 0.0  }
  0xc7   : > { %s3635_s14 = scalar_lea.vmem [#allocation11], %s2037_s16  ;;  %308 = sbr.rel (%p2038_p11) target bundleno = 215 (0xd7), region = 56  ;;  %309 = vst [vmem:[#allocation2] sm:$0xff] (!%p2038_p11), %v3281_v0  ;;  %310 = vst [vmem:[#allocation2 + $0x8] sm:$0xff] (!%p2038_p11), %v3281_v0 }
  0xc8   : > { %311 = vst [vmem:[#allocation2 + $0x10] sm:$0xff] (!%p2038_p11), %v3281_v0  ;;  %312 = vst [vmem:[#allocation2 + $0x18] sm:$0xff] (!%p2038_p11), %v3281_v0 }
  0xc9   : > { %313 = vst [vmem:[#allocation2 + $0x20] sm:$0xff] (!%p2038_p11), %v3281_v0  ;;  %314 = vst [vmem:[#allocation2 + $0x28] sm:$0xff] (!%p2038_p11), %v3281_v0 }
  0xca   : > { %315 = vst [vmem:[#allocation2 + $0x30] sm:$0xff] (!%p2038_p11), %v3281_v0  ;;  %316 = vst [vmem:[#allocation2 + $0x38] sm:$0xff] (!%p2038_p11), %v3281_v0 }
  0xcb   : > { %317 = vst [vmem:[#allocation2 + $0x40] sm:$0xff] (!%p2038_p11), %v3281_v0  ;;  %318 = vst [vmem:[#allocation2 + $0x48] sm:$0xff] (!%p2038_p11), %v3281_v0 }
  0xcc   : > { %319 = vst [vmem:[#allocation2 + $0x50] sm:$0xff] (!%p2038_p11), %v3281_v0  ;;  %320 = vst [vmem:[#allocation2 + $0x58] sm:$0xff] (!%p2038_p11), %v3281_v0 }
  0xcd   : > { %321 = vst [vmem:[#allocation2 + $0x60] sm:$0xff] (!%p2038_p11), %v3281_v0  ;;  %322 = vst [vmem:[#allocation2 + $0x68] sm:$0xff] (!%p2038_p11), %v3281_v0 }
  0xce   : > { %323 = vst [vmem:[#allocation2 + $0x70] sm:$0xff] %v3281_v0  ;;  %324 = vst [vmem:[#allocation2 + $0x78] sm:$0xff] %v3281_v0 }
  0xcf   : > { %325 = vst [vmem:[#allocation2 + $0x80] sm:$0xff] %v3281_v0  ;;  %326 = vst [vmem:[#allocation2 + $0x88] sm:$0xff] %v3281_v0 }
  0xd0   : > { %327 = vst [vmem:[#allocation2 + $0x90] sm:$0xff] %v3281_v0  ;;  %328 = vst [vmem:[#allocation2 + $0x98] sm:$0xff] %v3281_v0 }
  0xd1   : > { %329 = vst [vmem:[#allocation2 + $0xa0] sm:$0xff] %v3281_v0  ;;  %330 = vst [vmem:[#allocation2 + $0xa8] sm:$0xff] %v3281_v0 }
  0xd2   : > { %331 = vst [vmem:[#allocation2 + $0xb0] sm:$0xff] %v3281_v0  ;;  %332 = vst [vmem:[#allocation2 + $0xb8] sm:$0xff] %v3281_v0 }
  0xd3   : > { %333 = vst [vmem:[#allocation2 + $0xc0] sm:$0xff] %v3281_v0  ;;  %334 = vst [vmem:[#allocation2 + $0xc8] sm:$0xff] %v3281_v0 }
  0xd4   : > { %335 = vst [vmem:[#allocation2 + $0xd0] sm:$0xff] %v3281_v0  ;;  %336 = vst [vmem:[#allocation2 + $0xd8] sm:$0xff] %v3281_v0 }
  0xd5   : > { %337 = vst [vmem:[#allocation2 + $0xe0] sm:$0xff] %v3281_v0  ;;  %338 = vst [vmem:[#allocation2 + $0xe8] sm:$0xff] %v3281_v0 }
  0xd6   : > { %339 = vst [vmem:[#allocation2 + $0xf0] sm:$0xff] %v3281_v0  ;;  %340 = vst [vmem:[#allocation2 + $0xf8] sm:$0xff] %v3281_v0 }
  0xd7 PF: > { %v2866_v1 = vld [vmem:[%s3618_s13 + $0x40] sm:$0xff]   ;;  %v2870_v5 = vld [vmem:[%s3618_s13 + $0x48] sm:$0xff]   ;;  %v2874_v9 = vld [vmem:[%s3618_s13 + $0x50] sm:$0xff]   ;;  %s3931_s29 = sld [smem:[#allocation19_spill]] }
  0xd8   : > { %v2867_v2 = vld [vmem:[%s3618_s13 + $0xc0] sm:$0xff]   ;;  %2304 = vmatprep.subr.bf16.mxu0 %v2866_v1  ;;  %v2871_v6 = vld [vmem:[%s3618_s13 + $0xc8] sm:$0xff]   ;;  %v2875_v10 = vld [vmem:[%s3618_s13 + $0xd0] sm:$0xff]  }
  0xd9   : > { %v2868_v3 = vld [vmem:[%s3618_s13] sm:$0xff]   ;;  %2416 = vmatprep.subr.bf16.mxu1 %v2867_v2  ;;  %v2872_v7 = vld [vmem:[%s3618_s13 + $0x8] sm:$0xff]   ;;  %v2876_v11 = vld [vmem:[%s3618_s13 + $0x10] sm:$0xff]  }
  0xda   : > { %v2869_v4 = vld [vmem:[%s3618_s13 + $0x80] sm:$0xff]   ;;  %2305 = vmatpush3.bf16.msra.mxu0 %v2868_v3  ;;  %v2873_v8 = vld [vmem:[%s3618_s13 + $0x88] sm:$0xff]   ;;  %v2877_v12 = vld [vmem:[%s3618_s13 + $0x90] sm:$0xff]  }
  0xdb   : > { %2417 = vmatpush3.bf16.msra.mxu1 %v2869_v4  ;;  %2306 = vmatprep.subr.bf16.mxu0 %v2870_v5  ;;  %v2878_v13 = vld [vmem:[%s3618_s13 + $0x58] sm:$0xff]   ;;  %v2882_v17 = vld [vmem:[%s3618_s13 + $0x60] sm:$0xff]   ;;  %v2886_v21 = vld [vmem:[%s3618_s13 + $0x68] sm:$0xff]  }
  0xdc   : > { %2418 = vmatprep.subr.bf16.mxu1 %v2871_v6  ;;  %v2879_v14 = vld [vmem:[%s3618_s13 + $0xd8] sm:$0xff]   ;;  %v2883_v18 = vld [vmem:[%s3618_s13 + $0xe0] sm:$0xff]   ;;  %v2887_v22 = vld [vmem:[%s3618_s13 + $0xe8] sm:$0xff]  }
  0xdd   : > { %v2880_v15 = vld [vmem:[%s3618_s13 + $0x18] sm:$0xff]   ;;  %v2884_v19 = vld [vmem:[%s3618_s13 + $0x20] sm:$0xff]   ;;  %v2888_v23 = vld [vmem:[%s3618_s13 + $0x28] sm:$0xff]   ;;  %p2135_p10 = scmp.ne.s32.totalorder %s3931_s29, 1 }
  0xde   : > { %2307 = vmatpush3.bf16.msra.mxu0 %v2872_v7  ;;  %v2881_v16 = vld [vmem:[%s3618_s13 + $0x98] sm:$0xff]   ;;  %v2885_v20 = vld [vmem:[%s3618_s13 + $0xa0] sm:$0xff]   ;;  %v2889_v24 = vld [vmem:[%s3618_s13 + $0xa8] sm:$0xff]  }
  0xdf   : > { %2419 = vmatpush3.bf16.msra.mxu1 %v2873_v8  ;;  %2308 = vmatprep.subr.bf16.mxu0 %v2874_v9  ;;  %v2890_v25 = vld [vmem:[%s3618_s13 + $0x70] sm:$0xff]   ;;  %v2894_v29 = vld [vmem:[%s3618_s13 + $0x78] sm:$0xff]  }
  0xe0   : > { %2420 = vmatprep.subr.bf16.mxu1 %v2875_v10  ;;  %v2891_v26 = vld [vmem:[%s3618_s13 + $0xf0] sm:$0xff]   ;;  %v2895_v30 = vld [vmem:[%s3618_s13 + $0xf8] sm:$0xff]  }
  0xe1   : > { %v2892_v27 = vld [vmem:[%s3618_s13 + $0x30] sm:$0xff]   ;;  %v2896_v31 = vld [vmem:[%s3618_s13 + $0x38] sm:$0xff]  }
  0xe2   : > { %2309 = vmatpush3.bf16.msra.mxu0 %v2876_v11  ;;  %v2893_v28 = vld [vmem:[%s3618_s13 + $0xb0] sm:$0xff]   ;;  %v2897_v32 = vld [vmem:[%s3618_s13 + $0xb8] sm:$0xff]  }
  0xe3   : > { %2421 = vmatpush3.bf16.msra.mxu1 %v2877_v12  ;;  %2310 = vmatprep.subr.bf16.mxu0 %v2878_v13  ;;  %v2898_v33 = vld [vmem:[%s3610_s18] ss:$16 sps:$4 sm:$0xff]   ;;  %v2900_v34 = vld [vmem:[%s3610_s18 + $0x4] ss:$16 sps:$4 sm:$0xff]   ;;  %v2901_v35 = vld [vmem:[%s3610_s18 + $0x8] ss:$16 sps:$4 sm:$0xff]  }
  0xe4   : > { %2422 = vmatprep.subr.bf16.mxu1 %v2879_v14  ;;  %v2903_v36 = vld [vmem:[%s3610_s18 + $0xc] ss:$16 sps:$4 sm:$0xff]   ;;  %1045 = vmatprep.mubr.bf16.mxu0 %v2900_v34  ;;  %v2904_v37 = vld [vmem:[%s3610_s18 + $0x24] ss:$16 sps:$4 sm:$0xff]   ;;  %v2908_v39 = vld [vmem:[%s3610_s18 + $0x20] ss:$16 sps:$4 sm:$0xff]  }
  0xe5   : > { %1206 = vmatprep.mubr.bf16.mxu1 %v2903_v36  ;;  %v2906_v38 = vld [vmem:[%s3610_s18 + $0x2c] ss:$16 sps:$4 sm:$0xff]   ;;  %v2909_v40 = vld [vmem:[%s3610_s18 + $0x28] ss:$16 sps:$4 sm:$0xff]   ;;  %v2910_v41 = vld [vmem:[%s3610_s18 + $0x44] ss:$16 sps:$4 sm:$0xff]  }
  0xe6   : > { %2311 = vmatpush3.bf16.msra.mxu0 %v2880_v15  ;;  %v2912_v42 = vld [vmem:[%s3610_s18 + $0x4c] ss:$16 sps:$4 sm:$0xff]   ;;  %v2914_v43 = vld [vmem:[%s3610_s18 + $0x40] ss:$16 sps:$4 sm:$0xff]   ;;  %v2915_v44 = vld [vmem:[%s3610_s18 + $0x48] ss:$16 sps:$4 sm:$0xff]  }
  0xe7   : > { %2423 = vmatpush3.bf16.msra.mxu1 %v2881_v16  ;;  %2312 = vmatprep.subr.bf16.mxu0 %v2882_v17  ;;  %v2916_v45 = vld [vmem:[%s3610_s18 + $0x64] ss:$16 sps:$4 sm:$0xff]   ;;  %v2918_v46 = vld [vmem:[%s3610_s18 + $0x6c] ss:$16 sps:$4 sm:$0xff]   ;;  %v2920_v47 = vld [vmem:[%s3610_s18 + $0x60] ss:$16 sps:$4 sm:$0xff]  }
  0xe8   : > { %2424 = vmatprep.subr.bf16.mxu1 %v2883_v18  ;;  %v2921_v48 = vld [vmem:[%s3610_s18 + $0x68] ss:$16 sps:$4 sm:$0xff]   ;;  %v2922_v49 = vld [vmem:[%s3610_s18 + $0x84] ss:$16 sps:$4 sm:$0xff]   ;;  %v2924_v50 = vld [vmem:[%s3610_s18 + $0x8c] ss:$16 sps:$4 sm:$0xff]  }
  0xe9   : > { %v2926_v51 = vld [vmem:[%s3610_s18 + $0x80] ss:$16 sps:$4 sm:$0xff]   ;;  %v2927_v52 = vld [vmem:[%s3610_s18 + $0x88] ss:$16 sps:$4 sm:$0xff]   ;;  %v2928_v53 = vld [vmem:[%s3610_s18 + $0xa4] ss:$16 sps:$4 sm:$0xff]  }
  0xea   : > { %2313 = vmatpush3.bf16.msra.mxu0 %v2884_v19  ;;  %v2930_v54 = vld [vmem:[%s3610_s18 + $0xac] ss:$16 sps:$4 sm:$0xff]   ;;  %v2932_v55 = vld [vmem:[%s3610_s18 + $0xa0] ss:$16 sps:$4 sm:$0xff]   ;;  %v2933_v56 = vld [vmem:[%s3610_s18 + $0xa8] ss:$16 sps:$4 sm:$0xff]  }
  0xeb   : > { %2425 = vmatpush3.bf16.msra.mxu1 %v2885_v20  ;;  %2314 = vmatprep.subr.bf16.mxu0 %v2886_v21  ;;  %v2934_v57 = vld [vmem:[%s3610_s18 + $0xc4] ss:$16 sps:$4 sm:$0xff]   ;;  %v2936_v58 = vld [vmem:[%s3610_s18 + $0xcc] ss:$16 sps:$4 sm:$0xff]   ;;  %v2938_v59 = vld [vmem:[%s3610_s18 + $0xc0] ss:$16 sps:$4 sm:$0xff]  }
  0xec   : > { %2426 = vmatprep.subr.bf16.mxu1 %v2887_v22  ;;  %v2939_v60 = vld [vmem:[%s3610_s18 + $0xc8] ss:$16 sps:$4 sm:$0xff]   ;;  %v2940_v61 = vld [vmem:[%s3610_s18 + $0xe4] ss:$16 sps:$4 sm:$0xff]   ;;  %v2942_v62 = vld [vmem:[%s3610_s18 + $0xec] ss:$16 sps:$4 sm:$0xff]  }
  0xed   : > { %v2944_v63 = vld [vmem:[%s3610_s18 + $0xe0] ss:$16 sps:$4 sm:$0xff]   ;;  %v2945_v0 = vld [vmem:[%s3610_s18 + $0xe8] ss:$16 sps:$4 sm:$0xff]   ;;  %v2946_v1 = vld [vmem:[%s3610_s18 + $0x104] ss:$16 sps:$4 sm:$0xff]  }
  0xee   : > { %2315 = vmatpush3.bf16.msra.mxu0 %v2888_v23  ;;  %v2948_v2 = vld [vmem:[%s3610_s18 + $0x10c] ss:$16 sps:$4 sm:$0xff]   ;;  %v2950_v3 = vld [vmem:[%s3610_s18 + $0x100] ss:$16 sps:$4 sm:$0xff]   ;;  %v2951_v4 = vld [vmem:[%s3610_s18 + $0x108] ss:$16 sps:$4 sm:$0xff]  }
  0xef   : > { %2427 = vmatpush3.bf16.msra.mxu1 %v2889_v24  ;;  %2316 = vmatprep.subr.bf16.mxu0 %v2890_v25  ;;  %v2952_v5 = vld [vmem:[%s3610_s18 + $0x124] ss:$16 sps:$4 sm:$0xff]   ;;  %v2954_v6 = vld [vmem:[%s3610_s18 + $0x12c] ss:$16 sps:$4 sm:$0xff]   ;;  %v2956_v7 = vld [vmem:[%s3610_s18 + $0x120] ss:$16 sps:$4 sm:$0xff]  }
  0xf0   : > { %2428 = vmatprep.subr.bf16.mxu1 %v2891_v26  ;;  %v2957_v8 = vld [vmem:[%s3610_s18 + $0x128] ss:$16 sps:$4 sm:$0xff]   ;;  %v2958_v9 = vld [vmem:[%s3610_s18 + $0x144] ss:$16 sps:$4 sm:$0xff]   ;;  %v2960_v10 = vld [vmem:[%s3610_s18 + $0x14c] ss:$16 sps:$4 sm:$0xff]  }
  0xf1   : > { %v2962_v11 = vld [vmem:[%s3610_s18 + $0x140] ss:$16 sps:$4 sm:$0xff]   ;;  %v2963_v12 = vld [vmem:[%s3610_s18 + $0x148] ss:$16 sps:$4 sm:$0xff]   ;;  %v2964_v13 = vld [vmem:[%s3610_s18 + $0x164] ss:$16 sps:$4 sm:$0xff]  }
  0xf2   : > { %2317 = vmatpush3.bf16.msra.mxu0 %v2892_v27  ;;  %v2966_v14 = vld [vmem:[%s3610_s18 + $0x16c] ss:$16 sps:$4 sm:$0xff]   ;;  %v2968_v15 = vld [vmem:[%s3610_s18 + $0x160] ss:$16 sps:$4 sm:$0xff]   ;;  %v2969_v16 = vld [vmem:[%s3610_s18 + $0x168] ss:$16 sps:$4 sm:$0xff]  }
  0xf3   : > { %2429 = vmatpush3.bf16.msra.mxu1 %v2893_v28  ;;  %2318 = vmatprep.subr.bf16.mxu0 %v2894_v29  ;;  %v2970_v17 = vld [vmem:[%s3610_s18 + $0x184] ss:$16 sps:$4 sm:$0xff]   ;;  %v2972_v18 = vld [vmem:[%s3610_s18 + $0x18c] ss:$16 sps:$4 sm:$0xff]   ;;  %v2974_v19 = vld [vmem:[%s3610_s18 + $0x180] ss:$16 sps:$4 sm:$0xff]  }
  0xf4   : > { %2430 = vmatprep.subr.bf16.mxu1 %v2895_v30  ;;  %v2975_v20 = vld [vmem:[%s3610_s18 + $0x188] ss:$16 sps:$4 sm:$0xff]   ;;  %v2976_v21 = vld [vmem:[%s3610_s18 + $0x1a4] ss:$16 sps:$4 sm:$0xff]   ;;  %v2978_v22 = vld [vmem:[%s3610_s18 + $0x1ac] ss:$16 sps:$4 sm:$0xff]  }
  0xf5   : > { %v2980_v23 = vld [vmem:[%s3610_s18 + $0x1a0] ss:$16 sps:$4 sm:$0xff]   ;;  %v2981_v24 = vld [vmem:[%s3610_s18 + $0x1a8] ss:$16 sps:$4 sm:$0xff]   ;;  %v2982_v25 = vld [vmem:[%s3610_s18 + $0x1c4] ss:$16 sps:$4 sm:$0xff]  }
  0xf6   : > { %2319 = vmatpush3.bf16.msra.mxu0 %v2896_v31  ;;  %v2984_v26 = vld [vmem:[%s3610_s18 + $0x1cc] ss:$16 sps:$4 sm:$0xff]   ;;  %v2986_v27 = vld [vmem:[%s3610_s18 + $0x1c0] ss:$16 sps:$4 sm:$0xff]   ;;  %v2987_v28 = vld [vmem:[%s3610_s18 + $0x1c8] ss:$16 sps:$4 sm:$0xff]  }
  0xf7   : > { %2431 = vmatpush3.bf16.msra.mxu1 %v2897_v32  ;;  %v2988_v29 = vld [vmem:[%s3610_s18 + $0x1e4] ss:$16 sps:$4 sm:$0xff]   ;;  %v2990_v30 = vld [vmem:[%s3610_s18 + $0x1ec] ss:$16 sps:$4 sm:$0xff]   ;;  %v2992_v31 = vld [vmem:[%s3610_s18 + $0x1e0] ss:$16 sps:$4 sm:$0xff]  }
  0xf8   : > { %v2993_v32 = vld [vmem:[%s3610_s18 + $0x1e8] ss:$16 sps:$4 sm:$0xff]  }
  0xf9   : > { %1046 = vmatmul.mubr.bf16.vlgmr.msra.gmra.mrb[0].mxu0 %v2898_v33 }
  0xfa   : > { %1207 = vmatmul.mubr.bf16.vlgmr.msra.gmra.mrb[0].mxu1 %v2901_v35  ;;  %1053 = vmatprep.mubr.bf16.mxu0 %v2904_v37 }
  0xfb   : > { %1214 = vmatprep.mubr.bf16.mxu1 %v2906_v38 }
 0x101   : > { %1054 = vmatmul.mubr.bf16.gmra.mrb[4].mxu0 %v2908_v39 }
 0x102   : > { %1215 = vmatmul.mubr.bf16.gmra.mrb[4].mxu1 %v2909_v40  ;;  %1061 = vmatprep.mubr.bf16.mxu0 %v2910_v41 }
 0x103   : > { %1222 = vmatprep.mubr.bf16.mxu1 %v2912_v42  ;;  %v341_v42 = vld [vmem:[#allocation2] sm:$0xff] }
 0x109   : > { %1062 = vmatmul.mubr.bf16.gmra.mrb[8].mxu0 %v2914_v43 }
 0x10a   : > { %1223 = vmatmul.mubr.bf16.gmra.mrb[8].mxu1 %v2915_v44  ;;  %1069 = vmatprep.mubr.bf16.mxu0 %v2916_v45 }
 0x10b   : > { %1230 = vmatprep.mubr.bf16.mxu1 %v2918_v46 }
 0x111   : > { %1070 = vmatmul.mubr.bf16.gmra.mrb[12].mxu0 %v2920_v47  ;;  %v342_v47 = vld [vmem:[#allocation2 + $0x8] sm:$0xff] }
 0x112   : > { %1231 = vmatmul.mubr.bf16.gmra.mrb[12].mxu1 %v2921_v48  ;;  %1077 = vmatprep.mubr.bf16.mxu0 %v2922_v49 }
 0x113   : > { %1238 = vmatprep.mubr.bf16.mxu1 %v2924_v50 }
 0x119   : > { %1078 = vmatmul.mubr.bf16.gmra.mrb[16].mxu0 %v2926_v51 }
 0x11a   : > { %1239 = vmatmul.mubr.bf16.gmra.mrb[16].mxu1 %v2927_v52  ;;  %1085 = vmatprep.mubr.bf16.mxu0 %v2928_v53 }
 0x11b   : > { %1246 = vmatprep.mubr.bf16.mxu1 %v2930_v54 }
 0x121   : > { %1086 = vmatmul.mubr.bf16.gmra.mrb[20].mxu0 %v2932_v55 }
 0x122   : > { %1247 = vmatmul.mubr.bf16.gmra.mrb[20].mxu1 %v2933_v56  ;;  %1093 = vmatprep.mubr.bf16.mxu0 %v2934_v57 }
 0x123   : > { %1254 = vmatprep.mubr.bf16.mxu1 %v2936_v58 }
 0x129   : > { %1094 = vmatmul.mubr.bf16.gmra.mrb[24].mxu0 %v2938_v59 }
 0x12a   : > { %1255 = vmatmul.mubr.bf16.gmra.mrb[24].mxu1 %v2939_v60  ;;  %1101 = vmatprep.mubr.bf16.mxu0 %v2940_v61  ;;  %v343_v60 = vld [vmem:[#allocation2 + $0x10] sm:$0xff] }
 0x12b   : > { %1262 = vmatprep.mubr.bf16.mxu1 %v2942_v62 }
 0x131   : > { %1102 = vmatmul.mubr.bf16.gmra.mrb[28].mxu0 %v2944_v63 }
 0x132   : > { %1263 = vmatmul.mubr.bf16.gmra.mrb[28].mxu1 %v2945_v0  ;;  %1109 = vmatprep.mubr.bf16.mxu0 %v2946_v1  ;;  %v344_v1 = vld [vmem:[#allocation2 + $0x18] sm:$0xff] }
 0x133   : > { %1270 = vmatprep.mubr.bf16.mxu1 %v2948_v2 }
 0x139   : > { %1110 = vmatmul.mubr.bf16.gmra.mrb[32].mxu0 %v2950_v3 }
 0x13a   : > { %1271 = vmatmul.mubr.bf16.gmra.mrb[32].mxu1 %v2951_v4  ;;  %1117 = vmatprep.mubr.bf16.mxu0 %v2952_v5 }
 0x13b   : > { %1278 = vmatprep.mubr.bf16.mxu1 %v2954_v6 }
 0x141   : > { %1118 = vmatmul.mubr.bf16.gmra.mrb[36].mxu0 %v2956_v7 }
 0x142   : > { %1279 = vmatmul.mubr.bf16.gmra.mrb[36].mxu1 %v2957_v8  ;;  %1125 = vmatprep.mubr.bf16.mxu0 %v2958_v9 }
 0x143   : > { %1286 = vmatprep.mubr.bf16.mxu1 %v2960_v10 }
 0x149   : > { %1126 = vmatmul.mubr.bf16.gmra.mrb[40].mxu0 %v2962_v11 }
 0x14a   : > { %1287 = vmatmul.mubr.bf16.gmra.mrb[40].mxu1 %v2963_v12  ;;  %1133 = vmatprep.mubr.bf16.mxu0 %v2964_v13 }
 0x14b   : > { %1294 = vmatprep.mubr.bf16.mxu1 %v2966_v14  ;;  %v345_v14 = vld [vmem:[#allocation2 + $0x20] sm:$0xff] }
 0x151   : > { %1134 = vmatmul.mubr.bf16.gmra.mrb[44].mxu0 %v2968_v15 }
 0x152   : > { %1295 = vmatmul.mubr.bf16.gmra.mrb[44].mxu1 %v2969_v16  ;;  %1141 = vmatprep.mubr.bf16.mxu0 %v2970_v17 }
 0x153   : > { %1302 = vmatprep.mubr.bf16.mxu1 %v2972_v18 }
 0x159   : > { %1142 = vmatmul.mubr.bf16.gmra.mrb[48].mxu0 %v2974_v19  ;;  %v346_v19 = vld [vmem:[#allocation2 + $0x28] sm:$0xff] }
 0x15a   : > { %1303 = vmatmul.mubr.bf16.gmra.mrb[48].mxu1 %v2975_v20  ;;  %1149 = vmatprep.mubr.bf16.mxu0 %v2976_v21 }
 0x15b   : > { %1310 = vmatprep.mubr.bf16.mxu1 %v2978_v22 }
 0x161   : > { %1150 = vmatmul.mubr.bf16.gmra.mrb[52].mxu0 %v2980_v23 }
 0x162   : > { %1311 = vmatmul.mubr.bf16.gmra.mrb[52].mxu1 %v2981_v24  ;;  %1157 = vmatprep.mubr.bf16.mxu0 %v2982_v25 }
 0x163   : > { %1318 = vmatprep.mubr.bf16.mxu1 %v2984_v26 }
 0x169   : > { %1158 = vmatmul.mubr.bf16.gmra.mrb[56].mxu0 %v2986_v27 }
 0x16a   : > { %1319 = vmatmul.mubr.bf16.gmra.mrb[56].mxu1 %v2987_v28  ;;  %1165 = vmatprep.mubr.bf16.mxu0 %v2988_v29 }
 0x16b   : > { %1326 = vmatprep.mubr.bf16.mxu1 %v2990_v30 }
 0x171   : > { %1166 = vmatmul.mubr.bf16.gmra.mrb[60].mxu0 %v2992_v31 }
 0x172   : > { %1327 = vmatmul.mubr.bf16.gmra.mrb[60].mxu1 %v2993_v32  ;;  %v347_v32 = vld [vmem:[#allocation2 + $0x30] sm:$0xff] }
 0x1cc   : > { %v2320_v33 = vpop.f32.mrb[0].mxu0 }
 0x1cd   : > { %v2432_v34 = vpop.f32.mrb[0].mxu1  ;;  %v2321_v35 = vpop.f32.mrb[1].mxu0 }
 0x1ce   : > { %v2322_v36 = vadd.f32 %v2321_v35, %v2320_v33  ;;  %v2433_v37 = vpop.f32.mrb[1].mxu1  ;;  %v2323_v38 = vpop.f32.mrb[2].mxu0 }
 0x1cf   : > { %v2434_v39 = vadd.f32 %v2433_v37, %v2432_v34  ;;  %v2435_v40 = vpop.f32.mrb[2].mxu1  ;;  %v2324_v41 = vpop.f32.mrb[3].mxu0  ;;  %v348_v37 = vld [vmem:[#allocation2 + $0x38] sm:$0xff] }
 0x1d0   : > { %v2325_v43 = vadd.f32 %v2324_v41, %v2323_v38  ;;  %v2436_v44 = vpop.f32.mrb[3].mxu1 }
 0x1d1   : > { %v1209_v45 = vadd.f32 %v2434_v39, %v2322_v36  ;;  %v2437_v46 = vadd.f32 %v2436_v44, %v2435_v40 }
 0x1d3   : > { %v1335_v48 = vadd.f32 %v1209_v45, %v341_v42  ;;  %v1212_v49 = vadd.f32 %v2437_v46, %v2325_v43 }
 0x1d4   : > { %v2326_v50 = vpop.f32.mrb[4].mxu0 }
 0x1d5   : > { %1367 = vst [vmem:[#allocation2] sm:$0xff] %v1335_v48  ;;  %v1336_v51 = vadd.f32 %v1212_v49, %v342_v47  ;;  %v2438_v52 = vpop.f32.mrb[4].mxu1  ;;  %v2327_v53 = vpop.f32.mrb[5].mxu0 }
 0x1d6   : > { %v2328_v54 = vadd.f32 %v2327_v53, %v2326_v50  ;;  %v2439_v55 = vpop.f32.mrb[5].mxu1  ;;  %v2329_v56 = vpop.f32.mrb[6].mxu0  ;;  %v349_v50 = vld [vmem:[#allocation2 + $0x40] sm:$0xff] }
 0x1d7   : > { %1368 = vst [vmem:[#allocation2 + $0x8] sm:$0xff] %v1336_v51  ;;  %v2440_v57 = vadd.f32 %v2439_v55, %v2438_v52  ;;  %v2441_v58 = vpop.f32.mrb[6].mxu1  ;;  %v2330_v59 = vpop.f32.mrb[7].mxu0  ;;  %v350_v55 = vld [vmem:[#allocation2 + $0x48] sm:$0xff] }
 0x1d8   : > { %v2331_v61 = vadd.f32 %v2330_v59, %v2329_v56  ;;  %v2442_v62 = vpop.f32.mrb[7].mxu1 }
 0x1d9   : > { %v1217_v63 = vadd.f32 %v2440_v57, %v2328_v54  ;;  %v2443_v0 = vadd.f32 %v2442_v62, %v2441_v58 }
 0x1db   : > { %v1337_v2 = vadd.f32 %v1217_v63, %v343_v60  ;;  %v1220_v3 = vadd.f32 %v2443_v0, %v2331_v61 }
 0x1dc   : > { %v2332_v4 = vpop.f32.mrb[8].mxu0 }
 0x1dd   : > { %1369 = vst [vmem:[#allocation2 + $0x10] sm:$0xff] %v1337_v2  ;;  %v1338_v5 = vadd.f32 %v1220_v3, %v344_v1  ;;  %v2444_v6 = vpop.f32.mrb[8].mxu1  ;;  %v2333_v7 = vpop.f32.mrb[9].mxu0 }
 0x1de   : > { %v2334_v8 = vadd.f32 %v2333_v7, %v2332_v4  ;;  %v2445_v9 = vpop.f32.mrb[9].mxu1  ;;  %v2335_v10 = vpop.f32.mrb[10].mxu0  ;;  %v351_v4 = vld [vmem:[#allocation2 + $0x50] sm:$0xff] }
 0x1df   : > { %1370 = vst [vmem:[#allocation2 + $0x18] sm:$0xff] %v1338_v5  ;;  %v2446_v11 = vadd.f32 %v2445_v9, %v2444_v6  ;;  %v2447_v12 = vpop.f32.mrb[10].mxu1  ;;  %v2336_v13 = vpop.f32.mrb[11].mxu0  ;;  %v352_v9 = vld [vmem:[#allocation2 + $0x58] sm:$0xff] }
 0x1e0   : > { %v2337_v15 = vadd.f32 %v2336_v13, %v2335_v10  ;;  %v2448_v16 = vpop.f32.mrb[11].mxu1 }
 0x1e1   : > { %v1225_v17 = vadd.f32 %v2446_v11, %v2334_v8  ;;  %v2449_v18 = vadd.f32 %v2448_v16, %v2447_v12 }
 0x1e3   : > { %v1339_v20 = vadd.f32 %v1225_v17, %v345_v14  ;;  %v1228_v21 = vadd.f32 %v2449_v18, %v2337_v15 }
 0x1e4   : > { %v2338_v22 = vpop.f32.mrb[12].mxu0 }
 0x1e5   : > { %1371 = vst [vmem:[#allocation2 + $0x20] sm:$0xff] %v1339_v20  ;;  %v1340_v23 = vadd.f32 %v1228_v21, %v346_v19  ;;  %v2450_v24 = vpop.f32.mrb[12].mxu1  ;;  %v2339_v25 = vpop.f32.mrb[13].mxu0 }
 0x1e6   : > { %v2340_v26 = vadd.f32 %v2339_v25, %v2338_v22  ;;  %v2451_v27 = vpop.f32.mrb[13].mxu1  ;;  %v2341_v28 = vpop.f32.mrb[14].mxu0  ;;  %v353_v22 = vld [vmem:[#allocation2 + $0x60] sm:$0xff] }
 0x1e7   : > { %1372 = vst [vmem:[#allocation2 + $0x28] sm:$0xff] %v1340_v23  ;;  %v2452_v29 = vadd.f32 %v2451_v27, %v2450_v24  ;;  %v2453_v30 = vpop.f32.mrb[14].mxu1  ;;  %v2342_v31 = vpop.f32.mrb[15].mxu0  ;;  %v354_v27 = vld [vmem:[#allocation2 + $0x68] sm:$0xff] }
 0x1e8   : > { %v2343_v33 = vadd.f32 %v2342_v31, %v2341_v28  ;;  %v2454_v34 = vpop.f32.mrb[15].mxu1 }
 0x1e9   : > { %v1233_v35 = vadd.f32 %v2452_v29, %v2340_v26  ;;  %v2455_v36 = vadd.f32 %v2454_v34, %v2453_v30 }
 0x1eb   : > { %v1341_v38 = vadd.f32 %v1233_v35, %v347_v32  ;;  %v1236_v39 = vadd.f32 %v2455_v36, %v2343_v33 }
 0x1ec   : > { %v2344_v40 = vpop.f32.mrb[16].mxu0 }
 0x1ed   : > { %1373 = vst [vmem:[#allocation2 + $0x30] sm:$0xff] %v1341_v38  ;;  %v1342_v41 = vadd.f32 %v1236_v39, %v348_v37  ;;  %v2456_v42 = vpop.f32.mrb[16].mxu1  ;;  %v2345_v43 = vpop.f32.mrb[17].mxu0 }
 0x1ee   : > { %v2346_v44 = vadd.f32 %v2345_v43, %v2344_v40  ;;  %v2457_v45 = vpop.f32.mrb[17].mxu1  ;;  %v2347_v46 = vpop.f32.mrb[18].mxu0  ;;  %v355_v40 = vld [vmem:[#allocation2 + $0x70] sm:$0xff] }
 0x1ef   : > { %1374 = vst [vmem:[#allocation2 + $0x38] sm:$0xff] %v1342_v41  ;;  %v2458_v47 = vadd.f32 %v2457_v45, %v2456_v42  ;;  %v2459_v48 = vpop.f32.mrb[18].mxu1  ;;  %v2348_v49 = vpop.f32.mrb[19].mxu0  ;;  %v356_v45 = vld [vmem:[#allocation2 + $0x78] sm:$0xff] }
 0x1f0   : > { %v2349_v51 = vadd.f32 %v2348_v49, %v2347_v46  ;;  %v2460_v52 = vpop.f32.mrb[19].mxu1 }
 0x1f1   : > { %v1241_v53 = vadd.f32 %v2458_v47, %v2346_v44  ;;  %v2461_v54 = vadd.f32 %v2460_v52, %v2459_v48 }
 0x1f3   : > { %v1343_v56 = vadd.f32 %v1241_v53, %v349_v50  ;;  %v1244_v57 = vadd.f32 %v2461_v54, %v2349_v51 }
 0x1f4   : > { %v2350_v58 = vpop.f32.mrb[20].mxu0 }
 0x1f5   : > { %1375 = vst [vmem:[#allocation2 + $0x40] sm:$0xff] %v1343_v56  ;;  %v1344_v59 = vadd.f32 %v1244_v57, %v350_v55  ;;  %v2462_v60 = vpop.f32.mrb[20].mxu1  ;;  %v2351_v61 = vpop.f32.mrb[21].mxu0 }
 0x1f6   : > { %v2352_v62 = vadd.f32 %v2351_v61, %v2350_v58  ;;  %v2463_v63 = vpop.f32.mrb[21].mxu1  ;;  %v2353_v0 = vpop.f32.mrb[22].mxu0  ;;  %v357_v58 = vld [vmem:[#allocation2 + $0x80] sm:$0xff] }
 0x1f7   : > { %1376 = vst [vmem:[#allocation2 + $0x48] sm:$0xff] %v1344_v59  ;;  %v2464_v1 = vadd.f32 %v2463_v63, %v2462_v60  ;;  %v2465_v2 = vpop.f32.mrb[22].mxu1  ;;  %v2354_v3 = vpop.f32.mrb[23].mxu0  ;;  %v358_v63 = vld [vmem:[#allocation2 + $0x88] sm:$0xff] }
 0x1f8   : > { %v2355_v5 = vadd.f32 %v2354_v3, %v2353_v0  ;;  %v2466_v6 = vpop.f32.mrb[23].mxu1 }
 0x1f9   : > { %v1249_v7 = vadd.f32 %v2464_v1, %v2352_v62  ;;  %v2467_v8 = vadd.f32 %v2466_v6, %v2465_v2 }
 0x1fb   : > { %v1345_v10 = vadd.f32 %v1249_v7, %v351_v4  ;;  %v1252_v11 = vadd.f32 %v2467_v8, %v2355_v5 }
 0x1fc   : > { %v2356_v12 = vpop.f32.mrb[24].mxu0 }
 0x1fd   : > { %1377 = vst [vmem:[#allocation2 + $0x50] sm:$0xff] %v1345_v10  ;;  %v1346_v13 = vadd.f32 %v1252_v11, %v352_v9  ;;  %v2468_v14 = vpop.f32.mrb[24].mxu1  ;;  %v2357_v15 = vpop.f32.mrb[25].mxu0 }
 0x1fe   : > { %v2358_v16 = vadd.f32 %v2357_v15, %v2356_v12  ;;  %v2469_v17 = vpop.f32.mrb[25].mxu1  ;;  %v2359_v18 = vpop.f32.mrb[26].mxu0  ;;  %v359_v12 = vld [vmem:[#allocation2 + $0x90] sm:$0xff] }
 0x1ff   : > { %1378 = vst [vmem:[#allocation2 + $0x58] sm:$0xff] %v1346_v13  ;;  %v2470_v19 = vadd.f32 %v2469_v17, %v2468_v14  ;;  %v2471_v20 = vpop.f32.mrb[26].mxu1  ;;  %v2360_v21 = vpop.f32.mrb[27].mxu0  ;;  %v360_v17 = vld [vmem:[#allocation2 + $0x98] sm:$0xff] }
 0x200   : > { %v2361_v23 = vadd.f32 %v2360_v21, %v2359_v18  ;;  %v2472_v24 = vpop.f32.mrb[27].mxu1 }
 0x201   : > { %v1257_v25 = vadd.f32 %v2470_v19, %v2358_v16  ;;  %v2473_v26 = vadd.f32 %v2472_v24, %v2471_v20 }
 0x203   : > { %v1347_v28 = vadd.f32 %v1257_v25, %v353_v22  ;;  %v1260_v29 = vadd.f32 %v2473_v26, %v2361_v23 }
 0x204   : > { %v2362_v30 = vpop.f32.mrb[28].mxu0 }
 0x205   : > { %1379 = vst [vmem:[#allocation2 + $0x60] sm:$0xff] %v1347_v28  ;;  %v1348_v31 = vadd.f32 %v1260_v29, %v354_v27  ;;  %v2474_v32 = vpop.f32.mrb[28].mxu1  ;;  %v2363_v33 = vpop.f32.mrb[29].mxu0 }
 0x206   : > { %v2364_v34 = vadd.f32 %v2363_v33, %v2362_v30  ;;  %v2475_v35 = vpop.f32.mrb[29].mxu1  ;;  %v2365_v36 = vpop.f32.mrb[30].mxu0  ;;  %v361_v30 = vld [vmem:[#allocation2 + $0xa0] sm:$0xff] }
 0x207   : > { %1380 = vst [vmem:[#allocation2 + $0x68] sm:$0xff] %v1348_v31  ;;  %v2476_v37 = vadd.f32 %v2475_v35, %v2474_v32  ;;  %v2477_v38 = vpop.f32.mrb[30].mxu1  ;;  %v2366_v39 = vpop.f32.mrb[31].mxu0  ;;  %v362_v35 = vld [vmem:[#allocation2 + $0xa8] sm:$0xff] }
 0x208   : > { %v2367_v41 = vadd.f32 %v2366_v39, %v2365_v36  ;;  %v2478_v42 = vpop.f32.mrb[31].mxu1 }
 0x209   : > { %v1265_v43 = vadd.f32 %v2476_v37, %v2364_v34  ;;  %v2479_v44 = vadd.f32 %v2478_v42, %v2477_v38 }
 0x20b   : > { %v1349_v46 = vadd.f32 %v1265_v43, %v355_v40  ;;  %v1268_v47 = vadd.f32 %v2479_v44, %v2367_v41 }
 0x20c   : > { %v2368_v48 = vpop.f32.mrb[32].mxu0 }
 0x20d   : > { %1381 = vst [vmem:[#allocation2 + $0x70] sm:$0xff] %v1349_v46  ;;  %v1350_v49 = vadd.f32 %v1268_v47, %v356_v45  ;;  %v2480_v50 = vpop.f32.mrb[32].mxu1  ;;  %v2369_v51 = vpop.f32.mrb[33].mxu0 }
 0x20e   : > { %v2370_v52 = vadd.f32 %v2369_v51, %v2368_v48  ;;  %v2481_v53 = vpop.f32.mrb[33].mxu1  ;;  %v2371_v54 = vpop.f32.mrb[34].mxu0  ;;  %v363_v48 = vld [vmem:[#allocation2 + $0xb0] sm:$0xff] }
 0x20f   : > { %1382 = vst [vmem:[#allocation2 + $0x78] sm:$0xff] %v1350_v49  ;;  %v2482_v55 = vadd.f32 %v2481_v53, %v2480_v50  ;;  %v2483_v56 = vpop.f32.mrb[34].mxu1  ;;  %v2372_v57 = vpop.f32.mrb[35].mxu0  ;;  %v364_v53 = vld [vmem:[#allocation2 + $0xb8] sm:$0xff] }
 0x210   : > { %v2373_v59 = vadd.f32 %v2372_v57, %v2371_v54  ;;  %v2484_v60 = vpop.f32.mrb[35].mxu1 }
 0x211   : > { %v1273_v61 = vadd.f32 %v2482_v55, %v2370_v52  ;;  %v2485_v62 = vadd.f32 %v2484_v60, %v2483_v56 }
 0x213   : > { %v1351_v0 = vadd.f32 %v1273_v61, %v357_v58  ;;  %v1276_v1 = vadd.f32 %v2485_v62, %v2373_v59 }
 0x214   : > { %v2374_v2 = vpop.f32.mrb[36].mxu0 }
 0x215   : > { %1383 = vst [vmem:[#allocation2 + $0x80] sm:$0xff] %v1351_v0  ;;  %v1352_v3 = vadd.f32 %v1276_v1, %v358_v63  ;;  %v2486_v4 = vpop.f32.mrb[36].mxu1  ;;  %v2375_v5 = vpop.f32.mrb[37].mxu0 }
 0x216   : > { %v2376_v6 = vadd.f32 %v2375_v5, %v2374_v2  ;;  %v2487_v7 = vpop.f32.mrb[37].mxu1  ;;  %v2377_v8 = vpop.f32.mrb[38].mxu0  ;;  %v365_v2 = vld [vmem:[#allocation2 + $0xc0] sm:$0xff] }
 0x217   : > { %1384 = vst [vmem:[#allocation2 + $0x88] sm:$0xff] %v1352_v3  ;;  %v2488_v9 = vadd.f32 %v2487_v7, %v2486_v4  ;;  %v2489_v10 = vpop.f32.mrb[38].mxu1  ;;  %v2378_v11 = vpop.f32.mrb[39].mxu0  ;;  %v366_v7 = vld [vmem:[#allocation2 + $0xc8] sm:$0xff] }
 0x218   : > { %v2379_v13 = vadd.f32 %v2378_v11, %v2377_v8  ;;  %v2490_v14 = vpop.f32.mrb[39].mxu1 }
 0x219   : > { %v1281_v15 = vadd.f32 %v2488_v9, %v2376_v6  ;;  %v2491_v16 = vadd.f32 %v2490_v14, %v2489_v10 }
 0x21b   : > { %v1353_v18 = vadd.f32 %v1281_v15, %v359_v12  ;;  %v1284_v19 = vadd.f32 %v2491_v16, %v2379_v13 }
 0x21c   : > { %v2380_v20 = vpop.f32.mrb[40].mxu0 }
 0x21d   : > { %1385 = vst [vmem:[#allocation2 + $0x90] sm:$0xff] %v1353_v18  ;;  %v1354_v21 = vadd.f32 %v1284_v19, %v360_v17  ;;  %v2492_v22 = vpop.f32.mrb[40].mxu1  ;;  %v2381_v23 = vpop.f32.mrb[41].mxu0 }
 0x21e   : > { %v2382_v24 = vadd.f32 %v2381_v23, %v2380_v20  ;;  %v2493_v25 = vpop.f32.mrb[41].mxu1  ;;  %v2383_v26 = vpop.f32.mrb[42].mxu0  ;;  %v367_v20 = vld [vmem:[#allocation2 + $0xd0] sm:$0xff] }
 0x21f   : > { %1386 = vst [vmem:[#allocation2 + $0x98] sm:$0xff] %v1354_v21  ;;  %v2494_v27 = vadd.f32 %v2493_v25, %v2492_v22  ;;  %v2495_v28 = vpop.f32.mrb[42].mxu1  ;;  %v2384_v29 = vpop.f32.mrb[43].mxu0  ;;  %v368_v25 = vld [vmem:[#allocation2 + $0xd8] sm:$0xff] }
 0x220   : > { %v2385_v31 = vadd.f32 %v2384_v29, %v2383_v26  ;;  %v2496_v32 = vpop.f32.mrb[43].mxu1 }
 0x221   : > { %v1289_v33 = vadd.f32 %v2494_v27, %v2382_v24  ;;  %v2497_v34 = vadd.f32 %v2496_v32, %v2495_v28 }
 0x223   : > { %v1355_v36 = vadd.f32 %v1289_v33, %v361_v30  ;;  %v1292_v37 = vadd.f32 %v2497_v34, %v2385_v31 }
 0x224   : > { %v2386_v38 = vpop.f32.mrb[44].mxu0 }
 0x225   : > { %1387 = vst [vmem:[#allocation2 + $0xa0] sm:$0xff] %v1355_v36  ;;  %v1356_v39 = vadd.f32 %v1292_v37, %v362_v35  ;;  %v2498_v40 = vpop.f32.mrb[44].mxu1  ;;  %v2387_v41 = vpop.f32.mrb[45].mxu0 }
 0x226   : > { %v2388_v42 = vadd.f32 %v2387_v41, %v2386_v38  ;;  %v2499_v43 = vpop.f32.mrb[45].mxu1  ;;  %v2389_v44 = vpop.f32.mrb[46].mxu0  ;;  %v369_v38 = vld [vmem:[#allocation2 + $0xe0] sm:$0xff] }
 0x227   : > { %1388 = vst [vmem:[#allocation2 + $0xa8] sm:$0xff] %v1356_v39  ;;  %v2500_v45 = vadd.f32 %v2499_v43, %v2498_v40  ;;  %v2501_v46 = vpop.f32.mrb[46].mxu1  ;;  %v2390_v47 = vpop.f32.mrb[47].mxu0  ;;  %v370_v43 = vld [vmem:[#allocation2 + $0xe8] sm:$0xff] }
 0x228   : > { %v2391_v49 = vadd.f32 %v2390_v47, %v2389_v44  ;;  %v2502_v50 = vpop.f32.mrb[47].mxu1 }
 0x229   : > { %v1297_v51 = vadd.f32 %v2500_v45, %v2388_v42  ;;  %v2503_v52 = vadd.f32 %v2502_v50, %v2501_v46 }
 0x22b   : > { %v1357_v54 = vadd.f32 %v1297_v51, %v363_v48  ;;  %v1300_v55 = vadd.f32 %v2503_v52, %v2391_v49 }
 0x22c   : > { %v2392_v56 = vpop.f32.mrb[48].mxu0 }
 0x22d   : > { %1389 = vst [vmem:[#allocation2 + $0xb0] sm:$0xff] %v1357_v54  ;;  %v1358_v57 = vadd.f32 %v1300_v55, %v364_v53  ;;  %v2504_v58 = vpop.f32.mrb[48].mxu1  ;;  %v2393_v59 = vpop.f32.mrb[49].mxu0 }
 0x22e   : > { %v2394_v60 = vadd.f32 %v2393_v59, %v2392_v56  ;;  %v2505_v61 = vpop.f32.mrb[49].mxu1  ;;  %v2395_v62 = vpop.f32.mrb[50].mxu0  ;;  %v371_v56 = vld [vmem:[#allocation2 + $0xf0] sm:$0xff] }
 0x22f   : > { %1390 = vst [vmem:[#allocation2 + $0xb8] sm:$0xff] %v1358_v57  ;;  %v2506_v63 = vadd.f32 %v2505_v61, %v2504_v58  ;;  %v2507_v0 = vpop.f32.mrb[50].mxu1  ;;  %v2396_v1 = vpop.f32.mrb[51].mxu0  ;;  %v372_v61 = vld [vmem:[#allocation2 + $0xf8] sm:$0xff] }
 0x230   : > { %v2397_v3 = vadd.f32 %v2396_v1, %v2395_v62  ;;  %v2508_v4 = vpop.f32.mrb[51].mxu1  ;;  %v1435_v1 = vld [vmem:[#allocation8] sm:$0xff] (!%p2135_p10) }
 0x231   : > { %v1305_v5 = vadd.f32 %v2506_v63, %v2394_v60  ;;  %v2509_v6 = vadd.f32 %v2508_v4, %v2507_v0 }
 0x233   : > { %v1359_v8 = vadd.f32 %v1305_v5, %v365_v2  ;;  %v1308_v9 = vadd.f32 %v2509_v6, %v2397_v3  ;;  %v1436_v2 = vld [vmem:[#allocation8 + $0x8] sm:$0xff] (!%p2135_p10)  ;;  %v1437_v3 = vld [vmem:[#allocation8 + $0x10] sm:$0xff] (!%p2135_p10)  ;;  %v1438_v5 = vld [vmem:[#allocation8 + $0x18] sm:$0xff] (!%p2135_p10) }
 0x234   : > { %v2398_v10 = vpop.f32.mrb[52].mxu0  ;;  %v2656_v4 = vpack.c.bf16 (!%p2135_p10), %v1436_v2, %v1435_v1  ;;  %v2660_v6 = vpack.c.bf16 (!%p2135_p10), %v1438_v5, %v1437_v3 }
 0x235   : > { %1391 = vst [vmem:[#allocation2 + $0xc0] sm:$0xff] %v1359_v8  ;;  %v1360_v11 = vadd.f32 %v1308_v9, %v366_v7  ;;  %v2510_v12 = vpop.f32.mrb[52].mxu1  ;;  %v2399_v13 = vpop.f32.mrb[53].mxu0  ;;  %v1439_v7 = vld [vmem:[#allocation8 + $0x20] sm:$0xff] (!%p2135_p10)  ;;  %v1440_v8 = vld [vmem:[#allocation8 + $0x28] sm:$0xff] (!%p2135_p10) }
 0x236   : > { %v2400_v14 = vadd.f32 %v2399_v13, %v2398_v10  ;;  %v2511_v15 = vpop.f32.mrb[53].mxu1  ;;  %v2401_v16 = vpop.f32.mrb[54].mxu0  ;;  %2657 = vmatprep.subr.bf16.mxu0 (!%p2135_p10), %v2656_v4  ;;  %2688 = vmatprep.subr.bf16.mxu1 (!%p2135_p10), %v2656_v4  ;;  %v2664_v9 = vpack.c.bf16 (!%p2135_p10), %v1440_v8, %v1439_v7  ;;  %v1403_v10 = vld [vmem:[#allocation2] sm:$0xff] (!%p2135_p10)  ;;  %v1442_v13 = vld [vmem:[#allocation8 + $0x38] sm:$0xff] (!%p2135_p10) }
 0x237   : > { %1392 = vst [vmem:[#allocation2 + $0xc8] sm:$0xff] %v1360_v11  ;;  %v2512_v17 = vadd.f32 %v2511_v15, %v2510_v12  ;;  %v2513_v18 = vpop.f32.mrb[54].mxu1  ;;  %v2402_v19 = vpop.f32.mrb[55].mxu0  ;;  %2659 = vmatpush3.bf16.msra.mxu0 (!%p2135_p10), %v2656_v4  ;;  %2696 = vmatpush3.bf16.msra.mxu1 (!%p2135_p10), %v2656_v4  ;;  %v1419_v11 = vld [vmem:[#allocation2 + $0x80] sm:$0xff] (!%p2135_p10)  ;;  %v1441_v12 = vld [vmem:[#allocation8 + $0x30] sm:$0xff] (!%p2135_p10) }
 0x238   : > { %v2403_v21 = vadd.f32 %v2402_v19, %v2401_v16  ;;  %v2514_v22 = vpop.f32.mrb[55].mxu1  ;;  %2661 = vmatprep.subr.bf16.mxu0 (!%p2135_p10), %v2660_v6  ;;  %2689 = vmatprep.subr.bf16.mxu1 (!%p2135_p10), %v2660_v6  ;;  %v1443_v15 = vld [vmem:[#allocation8 + $0x40] sm:$0xff] (!%p2135_p10)  ;;  %v1444_v16 = vld [vmem:[#allocation8 + $0x48] sm:$0xff] (!%p2135_p10)  ;;  %v1446_v19 = vld [vmem:[#allocation8 + $0x58] sm:$0xff] (!%p2135_p10) }
 0x239   : > { %v1313_v23 = vadd.f32 %v2512_v17, %v2400_v14  ;;  %v2515_v24 = vadd.f32 %v2514_v22, %v2513_v18  ;;  %2608 = vmatprep.mubr.f32.mxu0 (!%p2135_p10), %v1403_v10  ;;  %2632 = vmatprep.mubr.f32.mxu1 (!%p2135_p10), %v1419_v11  ;;  %v2668_v14 = vpack.c.bf16 (!%p2135_p10), %v1442_v13, %v1441_v12  ;;  %v1445_v18 = vld [vmem:[#allocation8 + $0x50] sm:$0xff] (!%p2135_p10)  ;;  %v1448_v22 = vld [vmem:[#allocation8 + $0x68] sm:$0xff] (!%p2135_p10) }
 0x23a   : > { %v2672_v17 = vpack.c.bf16 (!%p2135_p10), %v1444_v16, %v1443_v15 }
 0x23b   : > { %v1361_v26 = vadd.f32 %v1313_v23, %v367_v20  ;;  %v1316_v27 = vadd.f32 %v2515_v24, %v2403_v21  ;;  %2663 = vmatpush3.bf16.msra.mxu0 (!%p2135_p10), %v2660_v6  ;;  %2697 = vmatpush3.bf16.msra.mxu1 (!%p2135_p10), %v2660_v6  ;;  %v2676_v20 = vpack.c.bf16 (!%p2135_p10), %v1446_v19, %v1445_v18  ;;  %v1447_v21 = vld [vmem:[#allocation8 + $0x60] sm:$0xff] (!%p2135_p10)  ;;  %v1449_v24 = vld [vmem:[#allocation8 + $0x70] sm:$0xff] (!%p2135_p10) }
 0x23c   : > { %v2404_v28 = vpop.f32.mrb[56].mxu0  ;;  %2665 = vmatprep.subr.bf16.mxu0 (!%p2135_p10), %v2664_v9  ;;  %2690 = vmatprep.subr.bf16.mxu1 (!%p2135_p10), %v2664_v9  ;;  %v2680_v23 = vpack.c.bf16 (!%p2135_p10), %v1448_v22, %v1447_v21 }
 0x23d   : > { %1393 = vst [vmem:[#allocation2 + $0xd0] sm:$0xff] %v1361_v26  ;;  %v1362_v29 = vadd.f32 %v1316_v27, %v368_v25  ;;  %v2516_v30 = vpop.f32.mrb[56].mxu1  ;;  %v2405_v31 = vpop.f32.mrb[57].mxu0  ;;  %v1450_v25 = vld [vmem:[#allocation8 + $0x78] sm:$0xff] (!%p2135_p10)  ;;  %v1404_v27 = vld [vmem:[#allocation2 + $0x8] sm:$0xff] (!%p2135_p10) }
 0x23e   : > { %v2406_v32 = vadd.f32 %v2405_v31, %v2404_v28  ;;  %v2517_v33 = vpop.f32.mrb[57].mxu1  ;;  %v2407_v34 = vpop.f32.mrb[58].mxu0  ;;  %v2684_v26 = vpack.c.bf16 (!%p2135_p10), %v1450_v25, %v1449_v24  ;;  %v1420_v28 = vld [vmem:[#allocation2 + $0x88] sm:$0xff] (!%p2135_p10)  ;;  %v1406_v31 = vld [vmem:[#allocation2 + $0x18] sm:$0xff] (!%p2135_p10) }
 0x23f   : > { %1394 = vst [vmem:[#allocation2 + $0xd8] sm:$0xff] %v1362_v29  ;;  %v2518_v35 = vadd.f32 %v2517_v33, %v2516_v30  ;;  %v2519_v36 = vpop.f32.mrb[58].mxu1  ;;  %v2408_v37 = vpop.f32.mrb[59].mxu0  ;;  %2667 = vmatpush3.bf16.msra.mxu0 (!%p2135_p10), %v2664_v9  ;;  %2698 = vmatpush3.bf16.msra.mxu1 (!%p2135_p10), %v2664_v9  ;;  %v1405_v29 = vld [vmem:[#allocation2 + $0x10] sm:$0xff] (!%p2135_p10)  ;;  %v1407_v33 = vld [vmem:[#allocation2 + $0x20] sm:$0xff] (!%p2135_p10) }
 0x240   : > { %v2409_v39 = vadd.f32 %v2408_v37, %v2407_v34  ;;  %v2520_v40 = vpop.f32.mrb[59].mxu1  ;;  %2669 = vmatprep.subr.bf16.mxu0 (!%p2135_p10), %v2668_v14  ;;  %2691 = vmatprep.subr.bf16.mxu1 (!%p2135_p10), %v2668_v14  ;;  %v1421_v30 = vld [vmem:[#allocation2 + $0x90] sm:$0xff] (!%p2135_p10)  ;;  %v1423_v34 = vld [vmem:[#allocation2 + $0xa0] sm:$0xff] (!%p2135_p10) }
 0x241   : > { %v1321_v41 = vadd.f32 %v2518_v35, %v2406_v32  ;;  %v2521_v42 = vadd.f32 %v2520_v40, %v2519_v36  ;;  %v1422_v32 = vld [vmem:[#allocation2 + $0x98] sm:$0xff] (!%p2135_p10)  ;;  %v1408_v35 = vld [vmem:[#allocation2 + $0x28] sm:$0xff] (!%p2135_p10)  ;;  %v1409_v37 = vld [vmem:[#allocation2 + $0x30] sm:$0xff] (!%p2135_p10) }
 0x242   : > { %v1424_v36 = vld [vmem:[#allocation2 + $0xa8] sm:$0xff] (!%p2135_p10)  ;;  %v1426_v40 = vld [vmem:[#allocation2 + $0xb8] sm:$0xff] (!%p2135_p10) }
 0x243   : > { %v1363_v44 = vadd.f32 %v1321_v41, %v369_v38  ;;  %v1324_v45 = vadd.f32 %v2521_v42, %v2409_v39  ;;  %2671 = vmatpush3.bf16.msra.mxu0 (!%p2135_p10), %v2668_v14  ;;  %2699 = vmatpush3.bf16.msra.mxu1 (!%p2135_p10), %v2668_v14  ;;  %v1425_v38 = vld [vmem:[#allocation2 + $0xb0] sm:$0xff] (!%p2135_p10)  ;;  %v1410_v39 = vld [vmem:[#allocation2 + $0x38] sm:$0xff] (!%p2135_p10)  ;;  %v1411_v41 = vld [vmem:[#allocation2 + $0x40] sm:$0xff] (!%p2135_p10) }
 0x244   : > { %v2410_v46 = vpop.f32.mrb[60].mxu0  ;;  %2673 = vmatprep.subr.bf16.mxu0 (!%p2135_p10), %v2672_v17  ;;  %2692 = vmatprep.subr.bf16.mxu1 (!%p2135_p10), %v2672_v17  ;;  %v1427_v42 = vld [vmem:[#allocation2 + $0xc0] sm:$0xff] (!%p2135_p10) }
 0x245   : > { %1395 = vst [vmem:[#allocation2 + $0xe0] sm:$0xff] %v1363_v44  ;;  %v1364_v47 = vadd.f32 %v1324_v45, %v370_v43  ;;  %v2522_v48 = vpop.f32.mrb[60].mxu1  ;;  %v2411_v49 = vpop.f32.mrb[61].mxu0  ;;  %v1412_v43 = vld [vmem:[#allocation2 + $0x48] sm:$0xff] (!%p2135_p10)  ;;  %v1413_v45 = vld [vmem:[#allocation2 + $0x50] sm:$0xff] (!%p2135_p10) }
 0x246   : > { %v2412_v50 = vadd.f32 %v2411_v49, %v2410_v46  ;;  %v2523_v51 = vpop.f32.mrb[61].mxu1  ;;  %v2413_v52 = vpop.f32.mrb[62].mxu0  ;;  %v1428_v44 = vld [vmem:[#allocation2 + $0xc8] sm:$0xff] (!%p2135_p10)  ;;  %v1429_v46 = vld [vmem:[#allocation2 + $0xd0] sm:$0xff] (!%p2135_p10)  ;;  %v1415_v49 = vld [vmem:[#allocation2 + $0x60] sm:$0xff] (!%p2135_p10) }
 0x247   : > { %1396 = vst [vmem:[#allocation2 + $0xe8] sm:$0xff] %v1364_v47  ;;  %v2524_v53 = vadd.f32 %v2523_v51, %v2522_v48  ;;  %v2525_v54 = vpop.f32.mrb[62].mxu1  ;;  %v2414_v55 = vpop.f32.mrb[63].mxu0  ;;  %2675 = vmatpush3.bf16.msra.mxu0 (!%p2135_p10), %v2672_v17  ;;  %2700 = vmatpush3.bf16.msra.mxu1 (!%p2135_p10), %v2672_v17  ;;  %v1414_v47 = vld [vmem:[#allocation2 + $0x58] sm:$0xff] (!%p2135_p10)  ;;  %v1416_v51 = vld [vmem:[#allocation2 + $0x68] sm:$0xff] (!%p2135_p10) }
 0x248   : > { %v2415_v57 = vadd.f32 %v2414_v55, %v2413_v52  ;;  %v2526_v58 = vpop.f32.mrb[63].mxu1  ;;  %2677 = vmatprep.subr.bf16.mxu0 (!%p2135_p10), %v2676_v20  ;;  %2693 = vmatprep.subr.bf16.mxu1 (!%p2135_p10), %v2676_v20  ;;  %v1430_v48 = vld [vmem:[#allocation2 + $0xd8] sm:$0xff] (!%p2135_p10) }
 0x249   : > { %v1329_v59 = vadd.f32 %v2524_v53, %v2412_v50  ;;  %v2527_v60 = vadd.f32 %v2526_v58, %v2525_v54  ;;  %1402 = sbr.rel (%p2135_p10) target bundleno = 846 (0x34e), region = 60  ;;  %v1417_v53 = vld [vmem:[#allocation2 + $0x70] sm:$0xff] (!%p2135_p10)  ;;  %v1418_v55 = vld [vmem:[#allocation2 + $0x78] sm:$0xff] (!%p2135_p10) }
 0x24b   : > { %v1365_v62 = vadd.f32 %v1329_v59, %v371_v56  ;;  %v1332_v63 = vadd.f32 %v2527_v60, %v2415_v57  ;;  %2679 = vmatpush3.bf16.msra.mxu0 (!%p2135_p10), %v2676_v20  ;;  %2701 = vmatpush3.bf16.msra.mxu1 (!%p2135_p10), %v2676_v20  ;;  %v3735_v57 = vld [vmem:[#allocation9] ss:$0 sm:$0xff] (!%p2135_p10) }
 0x24c   : > { %2681 = vmatprep.subr.bf16.mxu0 (!%p2135_p10), %v2680_v23  ;;  %2694 = vmatprep.subr.bf16.mxu1 (!%p2135_p10), %v2680_v23  ;;  %v1431_v50 = vld [vmem:[#allocation2 + $0xe0] sm:$0xff] (!%p2135_p10) }
 0x24d   : > { %1397 = vst [vmem:[#allocation2 + $0xf0] sm:$0xff] %v1365_v62  ;;  %v1366_v0 = vadd.f32 %v1332_v63, %v372_v61 }
 0x24e   : > { %v1432_v52 = vld [vmem:[#allocation2 + $0xe8] sm:$0xff] (!%p2135_p10) }
 0x24f   : > { %1398 = vst [vmem:[#allocation2 + $0xf8] sm:$0xff] %v1366_v0  ;;  %2683 = vmatpush3.bf16.msra.mxu0 (!%p2135_p10), %v2680_v23  ;;  %2702 = vmatpush3.bf16.msra.mxu1 (!%p2135_p10), %v2680_v23 }
 0x250   : > { %2685 = vmatprep.subr.bf16.mxu0 %v2684_v26  ;;  %2695 = vmatprep.subr.bf16.mxu1 %v2684_v26 }
 0x253   : > { %2687 = vmatpush3.bf16.msra.mxu0 %v2684_v26  ;;  %2703 = vmatpush3.bf16.msra.mxu1 %v2684_v26 }
 0x254   : > { %v1433_v54 = vld [vmem:[#allocation2 + $0xf0] sm:$0xff] }
 0x256   : > { %2609 = vmatmul.mubr.f32.vlgmr.msra.gmra.mrb[0].mxu0 %v1404_v27  ;;  %2633 = vmatmul.mubr.f32.vlgmr.msra.gmra.mrb[0].mxu1 %v1420_v28  ;;  %v1434_v56 = vld [vmem:[#allocation2 + $0xf8] sm:$0xff] }
 0x257   : > { %2611 = vmatprep.mubr.f32.mxu0 %v1405_v29  ;;  %2635 = vmatprep.mubr.f32.mxu1 %v1421_v30 }
 0x25a   : > { %2612 = vmatmul.mubr.f32.gmra.mrb[2].mxu0 %v1406_v31  ;;  %2636 = vmatmul.mubr.f32.gmra.mrb[2].mxu1 %v1422_v32 }
 0x25b   : > { %2614 = vmatprep.mubr.f32.mxu0 %v1407_v33  ;;  %2638 = vmatprep.mubr.f32.mxu1 %v1423_v34 }
 0x25e   : > { %2615 = vmatmul.mubr.f32.gmra.mrb[4].mxu0 %v1408_v35  ;;  %2639 = vmatmul.mubr.f32.gmra.mrb[4].mxu1 %v1424_v36 }
 0x25f   : > { %2617 = vmatprep.mubr.f32.mxu0 %v1409_v37  ;;  %2641 = vmatprep.mubr.f32.mxu1 %v1425_v38 }
 0x262   : > { %2618 = vmatmul.mubr.f32.gmra.mrb[6].mxu0 %v1410_v39  ;;  %2642 = vmatmul.mubr.f32.gmra.mrb[6].mxu1 %v1426_v40 }
 0x263   : > { %2620 = vmatprep.mubr.f32.mxu0 %v1411_v41  ;;  %2644 = vmatprep.mubr.f32.mxu1 %v1427_v42 }
 0x266   : > { %2621 = vmatmul.mubr.f32.gmra.mrb[8].mxu0 %v1412_v43  ;;  %2645 = vmatmul.mubr.f32.gmra.mrb[8].mxu1 %v1428_v44 }
 0x267   : > { %2623 = vmatprep.mubr.f32.mxu0 %v1413_v45  ;;  %2647 = vmatprep.mubr.f32.mxu1 %v1429_v46 }
 0x26a   : > { %2624 = vmatmul.mubr.f32.gmra.mrb[10].mxu0 %v1414_v47  ;;  %2648 = vmatmul.mubr.f32.gmra.mrb[10].mxu1 %v1430_v48 }
 0x26b   : > { %2626 = vmatprep.mubr.f32.mxu0 %v1415_v49  ;;  %2650 = vmatprep.mubr.f32.mxu1 %v1431_v50 }
 0x26e   : > { %2627 = vmatmul.mubr.f32.gmra.mrb[12].mxu0 %v1416_v51  ;;  %2651 = vmatmul.mubr.f32.gmra.mrb[12].mxu1 %v1432_v52 }
 0x26f   : > { %2629 = vmatprep.mubr.f32.mxu0 %v1417_v53  ;;  %2653 = vmatprep.mubr.f32.mxu1 %v1433_v54 }
 0x272   : > { %2630 = vmatmul.mubr.f32.gmra.mrb[14].mxu0 %v1418_v55  ;;  %2654 = vmatmul.mubr.f32.gmra.mrb[14].mxu1 %v1434_v56 }
 0x329   : > { %v2610_v58 = vpop.f32.mrb[0].mxu0  ;;  %v2634_v59 = vpop.f32.mrb[0].mxu1 }
 0x32a   : > { %v1530_v60 = vadd.f32 %v2610_v58, %v3735_v57  ;;  %v1610_v61 = vadd.f32 %v2634_v59, %v3735_v57  ;;  %v1524_v62 = vpop.f32.mrb[1].mxu0  ;;  %v1604_v63 = vpop.f32.mrb[1].mxu1 }
 0x32b   : > { %v1525_v0 = vadd.f32 %v3735_v57, %v1524_v62  ;;  %v1605_v1 = vadd.f32 %v3735_v57, %v1604_v63 }
 0x32c   : > { %v1684_v2 = vmax.f32 %v1530_v60, 0.0  ;;  %v1700_v3 = vmax.f32 %v1610_v61, 0.0 }
 0x32d   : > { %v1683_v4 = vmax.f32 %v1525_v0, 0.0  ;;  %v1699_v5 = vmax.f32 %v1605_v1, 0.0  ;;  %v2613_v6 = vpop.f32.mrb[2].mxu0  ;;  %v2637_v7 = vpop.f32.mrb[2].mxu1 }
 0x32e   : > { %v1540_v8 = vadd.f32 %v2613_v6, %v3735_v57  ;;  %v1620_v9 = vadd.f32 %v2637_v7, %v3735_v57  ;;  %v1534_v10 = vpop.f32.mrb[3].mxu0  ;;  %v1614_v11 = vpop.f32.mrb[3].mxu1 }
 0x32f   : > { %v2212_v12 = vpack.c.bf16 %v1684_v2, %v1683_v4  ;;  %v2252_v13 = vpack.c.bf16 %v1700_v3, %v1699_v5  ;;  %v1535_v14 = vadd.f32 %v3735_v57, %v1534_v10  ;;  %v1615_v15 = vadd.f32 %v3735_v57, %v1614_v11 }
 0x330   : > { %v1686_v16 = vmax.f32 %v1540_v8, 0.0  ;;  %v1702_v17 = vmax.f32 %v1620_v9, 0.0 }
 0x331   : > { %2213 = vst [vmem:[%s3635_s14] sm:$0xff] %v2212_v12   ;;  %2296 = vst [vmem:[%s3635_s14 + $0x40] sm:$0xff] %v2252_v13   ;;  %v1685_v18 = vmax.f32 %v1535_v14, 0.0  ;;  %v1701_v19 = vmax.f32 %v1615_v15, 0.0  ;;  %v2616_v20 = vpop.f32.mrb[4].mxu0  ;;  %v2640_v21 = vpop.f32.mrb[4].mxu1 }
 0x332   : > { %v1550_v22 = vadd.f32 %v2616_v20, %v3735_v57  ;;  %v1630_v23 = vadd.f32 %v2640_v21, %v3735_v57  ;;  %v1544_v24 = vpop.f32.mrb[5].mxu0  ;;  %v1624_v25 = vpop.f32.mrb[5].mxu1 }
 0x333   : > { %v2217_v26 = vpack.c.bf16 %v1686_v16, %v1685_v18  ;;  %v2257_v27 = vpack.c.bf16 %v1702_v17, %v1701_v19  ;;  %v1545_v28 = vadd.f32 %v3735_v57, %v1544_v24  ;;  %v1625_v29 = vadd.f32 %v3735_v57, %v1624_v25 }
 0x334   : > { %v1688_v30 = vmax.f32 %v1550_v22, 0.0  ;;  %v1704_v31 = vmax.f32 %v1630_v23, 0.0 }
 0x335   : > { %2289 = vst [vmem:[%s3635_s14 + $0x8] sm:$0xff] %v2217_v26   ;;  %2297 = vst [vmem:[%s3635_s14 + $0x48] sm:$0xff] %v2257_v27   ;;  %v1687_v32 = vmax.f32 %v1545_v28, 0.0  ;;  %v1703_v33 = vmax.f32 %v1625_v29, 0.0  ;;  %v2619_v34 = vpop.f32.mrb[6].mxu0  ;;  %v2643_v35 = vpop.f32.mrb[6].mxu1 }
 0x336   : > { %v1560_v36 = vadd.f32 %v2619_v34, %v3735_v57  ;;  %v1640_v37 = vadd.f32 %v2643_v35, %v3735_v57  ;;  %v1554_v38 = vpop.f32.mrb[7].mxu0  ;;  %v1634_v39 = vpop.f32.mrb[7].mxu1 }
 0x337   : > { %v2222_v40 = vpack.c.bf16 %v1688_v30, %v1687_v32  ;;  %v2262_v41 = vpack.c.bf16 %v1704_v31, %v1703_v33  ;;  %v1555_v42 = vadd.f32 %v3735_v57, %v1554_v38  ;;  %v1635_v43 = vadd.f32 %v3735_v57, %v1634_v39 }
 0x338   : > { %v1690_v44 = vmax.f32 %v1560_v36, 0.0  ;;  %v1706_v45 = vmax.f32 %v1640_v37, 0.0 }
 0x339   : > { %2290 = vst [vmem:[%s3635_s14 + $0x10] sm:$0xff] %v2222_v40   ;;  %2298 = vst [vmem:[%s3635_s14 + $0x50] sm:$0xff] %v2262_v41   ;;  %v1689_v46 = vmax.f32 %v1555_v42, 0.0  ;;  %v1705_v47 = vmax.f32 %v1635_v43, 0.0  ;;  %v2622_v48 = vpop.f32.mrb[8].mxu0  ;;  %v2646_v49 = vpop.f32.mrb[8].mxu1 }
 0x33a   : > { %v1570_v50 = vadd.f32 %v2622_v48, %v3735_v57  ;;  %v1650_v51 = vadd.f32 %v2646_v49, %v3735_v57  ;;  %v1564_v52 = vpop.f32.mrb[9].mxu0  ;;  %v1644_v53 = vpop.f32.mrb[9].mxu1 }
 0x33b   : > { %v2227_v54 = vpack.c.bf16 %v1690_v44, %v1689_v46  ;;  %v2267_v55 = vpack.c.bf16 %v1706_v45, %v1705_v47  ;;  %v1565_v56 = vadd.f32 %v3735_v57, %v1564_v52  ;;  %v1645_v58 = vadd.f32 %v3735_v57, %v1644_v53 }
 0x33c   : > { %v1692_v59 = vmax.f32 %v1570_v50, 0.0  ;;  %v1708_v60 = vmax.f32 %v1650_v51, 0.0 }
 0x33d   : > { %2291 = vst [vmem:[%s3635_s14 + $0x18] sm:$0xff] %v2227_v54   ;;  %2299 = vst [vmem:[%s3635_s14 + $0x58] sm:$0xff] %v2267_v55   ;;  %v1691_v61 = vmax.f32 %v1565_v56, 0.0  ;;  %v1707_v62 = vmax.f32 %v1645_v58, 0.0  ;;  %v2625_v63 = vpop.f32.mrb[10].mxu0  ;;  %v2649_v0 = vpop.f32.mrb[10].mxu1 }
 0x33e   : > { %v1580_v1 = vadd.f32 %v2625_v63, %v3735_v57  ;;  %v1660_v2 = vadd.f32 %v2649_v0, %v3735_v57  ;;  %v1574_v3 = vpop.f32.mrb[11].mxu0  ;;  %v1654_v4 = vpop.f32.mrb[11].mxu1 }
 0x33f   : > { %v2232_v5 = vpack.c.bf16 %v1692_v59, %v1691_v61  ;;  %v2272_v6 = vpack.c.bf16 %v1708_v60, %v1707_v62  ;;  %v1575_v7 = vadd.f32 %v3735_v57, %v1574_v3  ;;  %v1655_v8 = vadd.f32 %v3735_v57, %v1654_v4 }
 0x340   : > { %v1694_v9 = vmax.f32 %v1580_v1, 0.0  ;;  %v1710_v10 = vmax.f32 %v1660_v2, 0.0 }
 0x341   : > { %2292 = vst [vmem:[%s3635_s14 + $0x20] sm:$0xff] %v2232_v5   ;;  %2300 = vst [vmem:[%s3635_s14 + $0x60] sm:$0xff] %v2272_v6   ;;  %v1693_v11 = vmax.f32 %v1575_v7, 0.0  ;;  %v1709_v12 = vmax.f32 %v1655_v8, 0.0  ;;  %v2628_v13 = vpop.f32.mrb[12].mxu0  ;;  %v2652_v14 = vpop.f32.mrb[12].mxu1 }
 0x342   : > { %v1590_v15 = vadd.f32 %v2628_v13, %v3735_v57  ;;  %v1670_v16 = vadd.f32 %v2652_v14, %v3735_v57  ;;  %v1584_v17 = vpop.f32.mrb[13].mxu0  ;;  %v1664_v18 = vpop.f32.mrb[13].mxu1 }
 0x343   : > { %v2237_v19 = vpack.c.bf16 %v1694_v9, %v1693_v11  ;;  %v2277_v20 = vpack.c.bf16 %v1710_v10, %v1709_v12  ;;  %v1585_v21 = vadd.f32 %v3735_v57, %v1584_v17  ;;  %v1665_v22 = vadd.f32 %v3735_v57, %v1664_v18 }
 0x344   : > { %v1696_v23 = vmax.f32 %v1590_v15, 0.0  ;;  %v1712_v24 = vmax.f32 %v1670_v16, 0.0 }
 0x345   : > { %2293 = vst [vmem:[%s3635_s14 + $0x28] sm:$0xff] %v2237_v19   ;;  %2301 = vst [vmem:[%s3635_s14 + $0x68] sm:$0xff] %v2277_v20   ;;  %v1695_v25 = vmax.f32 %v1585_v21, 0.0  ;;  %v1711_v26 = vmax.f32 %v1665_v22, 0.0  ;;  %v2631_v27 = vpop.f32.mrb[14].mxu0  ;;  %v2655_v28 = vpop.f32.mrb[14].mxu1 }
 0x346   : > { %v1600_v29 = vadd.f32 %v2631_v27, %v3735_v57  ;;  %v1680_v30 = vadd.f32 %v2655_v28, %v3735_v57  ;;  %v1594_v31 = vpop.f32.mrb[15].mxu0  ;;  %v1674_v32 = vpop.f32.mrb[15].mxu1 }
 0x347   : > { %v2242_v33 = vpack.c.bf16 %v1696_v23, %v1695_v25  ;;  %v2282_v34 = vpack.c.bf16 %v1712_v24, %v1711_v26  ;;  %v1595_v35 = vadd.f32 %v3735_v57, %v1594_v31  ;;  %v1675_v36 = vadd.f32 %v3735_v57, %v1674_v32 }
 0x348   : > { %v1698_v37 = vmax.f32 %v1600_v29, 0.0  ;;  %v1714_v38 = vmax.f32 %v1680_v30, 0.0 }
 0x349   : > { %2294 = vst [vmem:[%s3635_s14 + $0x30] sm:$0xff] %v2242_v33   ;;  %2302 = vst [vmem:[%s3635_s14 + $0x70] sm:$0xff] %v2282_v34   ;;  %v1697_v39 = vmax.f32 %v1595_v35, 0.0  ;;  %v1713_v40 = vmax.f32 %v1675_v36, 0.0 }
 0x34b   : > { %v2247_v41 = vpack.c.bf16 %v1698_v37, %v1697_v39  ;;  %v2287_v42 = vpack.c.bf16 %v1714_v38, %v1713_v40 }
 0x34d   : > { %2295 = vst [vmem:[%s3635_s14 + $0x38] sm:$0xff] %v2247_v41   ;;  %2303 = vst [vmem:[%s3635_s14 + $0x78] sm:$0xff] %v2287_v42  }
 0x34e PF: > { %s3932_s15 = sld [smem:[#allocation20_spill]]  ;;  %s3934_s30 = sld [smem:[#allocation22_spill]] }
 0x34f   : > { %s3935_s2 = sld [smem:[#allocation29_spill]]  ;;  %s1889_s18 = sshll.u32 %s3635_s14, 4  ;;  %s3792_s18 = int_to_ptr.vmem [resolvable:$true] %s1889_s18 }
 0x350   : > { %s3796_s3 = scalar_lea.sflag [#allocation5], %s297_s5  ;;  %s3110_s27 = scalar_lea.vmem %s3792_s18, 2048 }
 0x351   : > { %p3111_p0 = scmp.ne.s32.totalorder %s3792_s18, %s3110_s27  ;;  %s3282_s4 = smov [#allocation11]  }
 0x352   : > { %s3114_s10 = sshll.u32 %s3282_s4, 4  ;;  %s3115_s10 = int_to_ptr.vmem [resolvable:$false] %s3114_s10 }
 0x353   : > { %s3116_s13 = scalar_lea.vmem %s3115_s10, 4096  ;;  %p3117_p12 = scmp.lt.s32.totalorder %s3792_s18, %s3115_s10 }
 0x354   : > { %s2208_s11 = sshll.u32 %s3932_s15, 11  ;;  %p3936_p9 = scmp.ne.s32.totalorder %s3934_s30, 0 }
 0x355   : > { %s3789_s9 = scalar_lea.hbm %s3935_s2, %s2208_s11  ;;  %p3118_p5 = scmp.lt.s32.totalorder %s3116_s13, %s3110_s27 }
 0x356   : > { %p3112_p13 = pnand %p3111_p0, %p3936_p9 }
 0x357   : > { %p3119_p4 = por %p3118_p5, %p3117_p12 }
 0x358   : > { %p3113_p8 = pneg %p3112_p13 }
 0x35a   : > { %p3120_p7 = pnand %p3119_p4, %p3113_p8 }
 0x35c   : > { %3123 = shalt.err (!%p3120_p7)
}
 0x35d   : > { %s3124_s6 = scalar_lea.hbm %s3789_s9, 2048  ;;  %s3128_s14 = scalar_lea.hbm %s3935_s2, 8192 }
 0x35e   : > { %p3125_p6 = scmp.ne.s32.totalorder %s3789_s9, %s3124_s6  ;;  %p3129_p3 = scmp.lt.u32.totalorder %s3789_s9, %s3935_s2 }
 0x35f   : > { %p3130_p11 = scmp.lt.u32.totalorder %s3128_s14, %s3124_s6  ;;  %p3132_p0 = scmp.lt.u32.totalorder %s3124_s6, %s3789_s9 }
 0x360   : > { %p3126_p1 = pnand %p3125_p6, %p3936_p9 }
 0x361   : > { %p3131_p10 = por %p3130_p11, %p3129_p3 }
 0x362   : > { %p3127_p2 = pneg %p3126_p1 }
 0x363   : > { %p3133_p13 = por %p3132_p0, %p3131_p10 }
 0x365   : > { %p3134_p8 = pnand %p3133_p13, %p3127_p2 }
 0x367   : > { %3137 = shalt.err (!%p3134_p8)
}
 0x368   : > { %s3283_s15 = smov 64   ;;  %s3284_s8 = smov 4  }
 0x369   : > { %2716 = dma.vmem_to_hbm [thread:$0]  (%p3936_p9), %s3792_s18, 2048, %s3789_s9, %s3796_s3, %s3283_s15, %s3283_s15, %s3284_s8  }
 0x36a PF: > { %s3937_s11 = sld [smem:[#allocation17_spill]]  ;;  %s3938_s21 = sld [smem:[#allocation23_spill]] }
 0x36b   : > { %p2741_p12 = scmp.ge.s32.totalorder %s3268_s28, 2 }
 0x370   : > { %s1904_s0 = sand.u32 1, %s3937_s11   ;;  %p3939_p5 = scmp.ne.s32.totalorder %s3938_s21, 0 }
 0x371   : > { %s1905_s27 = scalar_lea.sflag [#allocation5], %s1904_s0 }
 0x372   : > { %p2733_p4 = pnand %p2741_p12, %p3939_p5 }
 0x374   : > { %3211 = dma.done.wait (!%p2733_p4), %s1905_s27, 2048  }
 0x375   : > { %3213 = vsyncadd (!%p2733_p4), %s1905_s27, 4294965248  ;;  %s24_s28 = sadd.s32 1, %s3268_s28   ;;  %s3941_s15 = sld [smem:[#allocation18_spill]] }
 0x376   : > { %p3825_p7 = scmp.ge.s32.totalorder %s24_s28, 10   ;;  %s3942_s30 = sld [smem:[#allocation21_spill]] }
 0x377   : > { %s3943_s9 = sld [smem:[#allocation24_spill]]  ;;  %s3944_s27 = sld [smem:[#allocation25_spill]] }
 0x378   : > { %s3945_s16 = smov %s3224_s17  ;;  %s3946_s17 = smov %s3504_s25 }
 0x379   : > { %s3947_s18 = smov %s3232_s19  ;;  %s3948_s19 = smov %s3236_s20 }
 0x37a   : > { %s3949_s20 = smov %s3560_s12  ;;  %s3950_s21 = smov %s3244_s22 }
 0x37b   : > { %s3951_s22 = smov %s3248_s23  ;;  %s3952_s23 = smov %s3507_s24 }
 0x37c   : > { %s3953_s24 = smov %s3260_s26  ;;  %s3954_s25 = smov %s3942_s30 }
 0x37d   : > { %s3955_s26 = smov %s3943_s9  ;;  %23 = sbr.rel (!%p3825_p7) target bundleno = 18 (0x12), region = 110 }
 0x384   :  { %1910 = vsyncpa [#allocation4], 1 }
 0x385   :  { %1912 = vsyncpa [#allocation4 + $0x1], 1 }
 0x386   :  { %1913 = vsyncpa [#allocation7], 1 }
 0x387   :  { %1915 = vsyncpa [#allocation7 + $0x1], 1 }
 0x388   :  { %1916 = vsyncpa [#allocation10], 1 }
 0x389   :  { %1917 = vsyncpa [#allocation5], 1 }
 0x38a   :  { %1919 = vsyncpa [#allocation5 + $0x1], 1 }

</bundles_post_ra>
